<compile_context>
chip_gen: v7x
topology: tpu7x:2x2x1
jax: 0.10.0
libtpu: 0.0.40
codegen_flags: <defaults>
</compile_context>

<pallas_src>
import jax
import jax.numpy as jnp
from jax.experimental import pallas as pl
from jax.experimental.pallas import tpu as pltpu


def _conv1x1_hardact_kernel(x_ref, w_ref, b3_ref, o_ref):
    # x_ref : (1, Cin, TM)   zero-padded input, channels on sublanes, spatial on lanes
    # w_ref : (Cout, Cin)    full weight, resident per tile (tiny)
    # b3_ref: (Cout, 1)      bias + 3 (the "+3" of the module folded in)
    # o_ref : (1, Cout, TM)  lane-dense, fully aligned output store
    x = x_ref[0]                       # (Cin, TM)
    w = w_ref[...]                     # (Cout, Cin)
    cout, cin = w.shape
    tm = x.shape[1]

    # Tiny channel contraction: unrolled VPU multiply-add (Cin = 3).
    y = jnp.broadcast_to(b3_ref[...], (cout, tm))        # conv bias (+3) everywhere
    for k in range(cin):                                  # static unroll
        y = y + w[:, k:k + 1] * x[k:k + 1, :]

    # x4 = clamp_max(conv + 3, 6); out = x4*x4/6 + 6.
    # clamp_min(out, 0) of the torch module is a no-op (x4*x4/6 >= 0 -> out >= 6).
    x4 = jnp.minimum(y, 6.0)
    o_ref[0] = (x4 * x4) * (1.0 / 6.0) + 6.0


def conv1x1_pad1_fused(x_nchw, weight, bias, *, vmem_budget_bytes=8 << 20):
    """Conv2d(3, 13, 1, stride=1, padding=1) + elementwise chain, fully fused.

    x_nchw: (N, Cin, H, W) f32; weight: (Cout, Cin, 1, 1); bias: (Cout,)
    returns (N, Cout, H+2, W+2) f32
    """
    n, cin, h, w = x_nchw.shape
    cout = weight.shape[0]
    hp, wp = h + 2, w + 2
    m = hp * wp

    # padding=1 with a 1x1 kernel: zero-pad the *input* once (cheap, 3 channels)
    # so the kernel emits the padded output directly; border = act(bias) for free.
    xp = jnp.pad(x_nchw, ((0, 0), (0, 0), (1, 1), (1, 1)))
    x_mat = xp.reshape(n, cin, m)                    # free row-major reshape
    w_mat = weight.reshape(cout, cin).astype(jnp.float32)
    b3 = (bias.astype(jnp.float32) + 3.0).reshape(cout, 1)   # fold the +3

    # One tile per batch when it fits; otherwise largest 128-multiple tile that
    # keeps double-buffered in+out blocks under the VMEM budget (v7x-safe).
    bytes_per_col = (cin + cout) * 4 * 2             # in + out, double-buffered
    cap = max(128, (vmem_budget_bytes // bytes_per_col) // 128 * 128)
    tm = m if m <= cap else cap
    n_tiles = pl.cdiv(m, tm)
    grid = (n, n_tiles)

    flops = n * cout * m * (2 * cin + 5)
    bytes_accessed = 4 * (n * cin * m + n * cout * m + cout * cin + cout)

    out = pl.pallas_call(
        _conv1x1_hardact_kernel,
        out_shape=jax.ShapeDtypeStruct((n, cout, m), jnp.float32),
        grid=grid,
        in_specs=[
            pl.BlockSpec((1, cin, tm), lambda b, i: (b, 0, i)),
            pl.BlockSpec((cout, cin), lambda b, i: (0, 0)),
            pl.BlockSpec((cout, 1), lambda b, i: (0, 0)),
        ],
        out_specs=pl.BlockSpec((1, cout, tm), lambda b, i: (b, 0, i)),
        compiler_params=pltpu.CompilerParams(
            dimension_semantics=("parallel", "parallel")),
        cost_estimate=pl.CostEstimate(
            flops=flops, transcendentals=0, bytes_accessed=bytes_accessed),
    )(x_mat, w_mat, b3)

    return out.reshape(n, cout, hp, wp)


def _reference(x_nchw, weight, bias):
    # pure-JAX reference of the PyTorch forward
    y = jax.lax.conv_general_dilated(
        x_nchw, weight, window_strides=(1, 1), padding=((1, 1), (1, 1)),
        dimension_numbers=("NCHW", "OIHW", "NCHW"))
    y = y + bias.reshape(1, -1, 1, 1)
    x4 = jnp.minimum(y + 3.0, 6.0)
    x8 = (x4 * x4) / 6.0
    return jnp.maximum(x8 + 6.0, 0.0)


if __name__ == "__main__":
    key = jax.random.PRNGKey(0)
    kx, kw, kb = jax.random.split(key, 3)

    # shapes consistent with the module: Conv2d(3, 13, 1, padding=1), 64x64 input
    N, CIN, H, W = 2, 3, 64, 64
    COUT = 13

    x1 = jax.random.normal(kx, (N, CIN, H, W), dtype=jnp.float32)
    # deterministic synthetic parameters (not a checkpoint load)
    weight = jax.random.normal(kw, (COUT, CIN, 1, 1), dtype=jnp.float32) * 0.1
    bias = jax.random.normal(kb, (COUT,), dtype=jnp.float32) * 0.1

    fused = jax.jit(conv1x1_pad1_fused)
    out = jax.block_until_ready(fused(x1, weight, bias))

    ref = jax.block_until_ready(_reference(x1, weight, bias))
    assert out.shape == (N, COUT, H + 2, W + 2), out.shape
    assert jnp.allclose(out, ref, atol=1e-4, rtol=1e-4), float(
        jnp.max(jnp.abs(out - ref)))

    print("KERNEL_OK")
</pallas_src>

<mosaic_0001>
module attributes {stable_mosaic.version = 11 : i64} {
  func.func @_conv1x1_hardact_kernel(%arg0: i32, %arg1: i32, %arg2: memref<1x3x4356xf32, #tpu.memory_space<vmem>>, %arg3: memref<13x3xf32, #tpu.memory_space<vmem>>, %arg4: memref<13x1xf32, #tpu.memory_space<vmem>>, %arg5: memref<1x13x4356xf32, #tpu.memory_space<vmem>>) attributes {dimension_semantics = [#tpu.dimension_semantics<parallel>, #tpu.dimension_semantics<parallel>], iteration_bounds = array<i64: 2, 1>, scalar_prefetch = 0 : i64, scratch_operands = 0 : i64, tpu.core_type = #tpu.core_type<tc>, window_params = [{transform_indices = @transform_0, window_bounds = array<i64: 1, 3, 4356>}, {pipeline_mode = #tpu.pipeline_mode<synchronous>, transform_indices = @transform_1, window_bounds = array<i64: 13, 3>}, {pipeline_mode = #tpu.pipeline_mode<synchronous>, transform_indices = @transform_2, window_bounds = array<i64: 13, 1>}, {transform_indices = @transform_3, window_bounds = array<i64: 1, 13, 4356>}]} {
    %c0 = arith.constant 0 : index
    %c0_0 = arith.constant 0 : index
    %c0_1 = arith.constant 0 : index
    %0 = vector.load %arg2[%c0, %c0_0, %c0_1] : memref<1x3x4356xf32, #tpu.memory_space<vmem>>, vector<1x3x4356xf32>
    %1 = vector.shape_cast %0 : vector<1x3x4356xf32> to vector<3x4356xf32>
    %c0_2 = arith.constant 0 : index
    %c0_3 = arith.constant 0 : index
    %2 = vector.load %arg3[%c0_2, %c0_3] : memref<13x3xf32, #tpu.memory_space<vmem>>, vector<13x3xf32>
    %c0_4 = arith.constant 0 : index
    %c0_5 = arith.constant 0 : index
    %3 = vector.load %arg4[%c0_4, %c0_5] : memref<13x1xf32, #tpu.memory_space<vmem>>, vector<13x1xf32>
    %4 = vector.shape_cast %3 : vector<13x1xf32> to vector<13x1xf32>
    %5 = vector.broadcast %4 : vector<13x1xf32> to vector<13x4356xf32>
    %6 = vector.extract_strided_slice %2 {offsets = [0, 0], sizes = [13, 1], strides = [1, 1]} : vector<13x3xf32> to vector<13x1xf32>
    %7 = vector.extract_strided_slice %1 {offsets = [0, 0], sizes = [1, 4356], strides = [1, 1]} : vector<3x4356xf32> to vector<1x4356xf32>
    %8 = vector.broadcast %6 : vector<13x1xf32> to vector<13x4356xf32>
    %9 = vector.broadcast %7 : vector<1x4356xf32> to vector<13x4356xf32>
    %10 = arith.mulf %8, %9 : vector<13x4356xf32>
    %11 = arith.addf %5, %10 : vector<13x4356xf32>
    %12 = vector.extract_strided_slice %2 {offsets = [0, 1], sizes = [13, 1], strides = [1, 1]} : vector<13x3xf32> to vector<13x1xf32>
    %13 = vector.extract_strided_slice %1 {offsets = [1, 0], sizes = [1, 4356], strides = [1, 1]} : vector<3x4356xf32> to vector<1x4356xf32>
    %14 = vector.broadcast %12 : vector<13x1xf32> to vector<13x4356xf32>
    %15 = vector.broadcast %13 : vector<1x4356xf32> to vector<13x4356xf32>
    %16 = arith.mulf %14, %15 : vector<13x4356xf32>
    %17 = arith.addf %11, %16 : vector<13x4356xf32>
    %18 = vector.extract_strided_slice %2 {offsets = [0, 2], sizes = [13, 1], strides = [1, 1]} : vector<13x3xf32> to vector<13x1xf32>
    %19 = vector.extract_strided_slice %1 {offsets = [2, 0], sizes = [1, 4356], strides = [1, 1]} : vector<3x4356xf32> to vector<1x4356xf32>
    %20 = vector.broadcast %18 : vector<13x1xf32> to vector<13x4356xf32>
    %21 = vector.broadcast %19 : vector<1x4356xf32> to vector<13x4356xf32>
    %22 = arith.mulf %20, %21 : vector<13x4356xf32>
    %23 = arith.addf %17, %22 : vector<13x4356xf32>
    %cst = arith.constant 6.000000e+00 : f32
    %24 = vector.broadcast %cst : f32 to vector<13x4356xf32>
    %25 = arith.minimumf %23, %24 : vector<13x4356xf32>
    %26 = arith.mulf %25, %25 : vector<13x4356xf32>
    %cst_6 = arith.constant 0.166666672 : f32
    %27 = vector.broadcast %cst_6 : f32 to vector<13x4356xf32>
    %28 = arith.mulf %26, %27 : vector<13x4356xf32>
    %cst_7 = arith.constant 6.000000e+00 : f32
    %29 = vector.broadcast %cst_7 : f32 to vector<13x4356xf32>
    %30 = arith.addf %28, %29 : vector<13x4356xf32>
    %c0_8 = arith.constant 0 : index
    %c0_9 = arith.constant 0 : index
    %c0_10 = arith.constant 0 : index
    %31 = vector.load %arg5[%c0_8, %c0_9, %c0_10] : memref<1x13x4356xf32, #tpu.memory_space<vmem>>, vector<1x13x4356xf32>
    %32 = vector.shape_cast %31 : vector<1x13x4356xf32> to vector<13x4356xf32>
    %33 = vector.shape_cast %30 : vector<13x4356xf32> to vector<1x13x4356xf32>
    tpu.vector_store %arg5[%c0_8, %c0_9, %c0_10], %33 {strides = array<i32>} : memref<1x13x4356xf32, #tpu.memory_space<vmem>>, vector<1x13x4356xf32>,
    return
  }
  func.func @transform_0(%arg0: i32, %arg1: i32) -> (i32, i32, i32) {
    %c0_i32 = arith.constant 0 : i32
    %c0_i32_0 = arith.constant 0 : i32
    return %arg0, %c0_i32, %arg1 : i32, i32, i32
  }
  func.func @transform_1(%arg0: i32, %arg1: i32) -> (i32, i32) {
    %c0_i32 = arith.constant 0 : i32
    %c0_i32_0 = arith.constant 0 : i32
    %c0_i32_1 = arith.constant 0 : i32
    return %c0_i32, %c0_i32_0 : i32, i32
  }
  func.func @transform_2(%arg0: i32, %arg1: i32) -> (i32, i32) {
    %c0_i32 = arith.constant 0 : i32
    %c0_i32_0 = arith.constant 0 : i32
    %c0_i32_1 = arith.constant 0 : i32
    return %c0_i32, %c0_i32_0 : i32, i32
  }
  func.func @transform_3(%arg0: i32, %arg1: i32) -> (i32, i32, i32) {
    %c0_i32 = arith.constant 0 : i32
    %c0_i32_0 = arith.constant 0 : i32
    return %arg0, %c0_i32, %arg1 : i32, i32, i32
  }
}

</mosaic_0001>

<bundles_post_ra>
// kernel: conv1x1_pad1_fused.1
= control target key start
LH: loop header
LB: loop body
LE: loop exit
PB: predicated region body
PF: predicated region fallthrough
CT: control target
= control target key end

     0   :  { %s2181_s12 = smov 0   ;;  %s2183_s13 = smov 0   ;;  %s3866_s0 = inlined_call_operand.vmem [shape: f32[2,3,4356], index: 0, kind: input, shape index: {}]   ;;  %s3867_s1 = inlined_call_operand.vmem [shape: f32[13,3], index: 1, kind: input, shape index: {}]   ;;  %s3868_s2 = inlined_call_operand.vmem [shape: f32[13,1], index: 2, kind: input, shape index: {}]   ;;  %s3869_s3 = inlined_call_operand.vmem [shape: f32[2,13,4356], index: 3, kind: output, shape index: {}]  }
   0x1   :  { %s2185_s14 = smov 0  }
   0x2 LB: > { %s25_s15 = sadd.s32 1, %s2152_s13  ;;  %p2094_p0 = scmp.ge.s32.totalorder %s2156_s14, 1  ;;  %s2156_s14 = sphi %s2185_s14, %s13_s14   ;;  %s2152_s13 = sphi %s2183_s13, %s4415_s13   ;;  %s2148_s12 = sphi %s2181_s12, %s4414_s12  }
   0x3   : > { %p27_p1 = scmp.ge.s32.totalorder %s25_s15, 2  ;;  %p158_p2 = scmp.lt.s32.totalorder %s2156_s14, 3 }
   0x5   : > { %s4417_s15 = smov (%p27_p1, %s25_s15), 0  ;;  %p159_p3 = pnand %p2094_p0, %p158_p2 }
   0x7   : > { %162 = sbr.rel (%p159_p3) target bundleno = 352 (0x160), region = 32 }
   0xe   : > { %v230_v0 = vld [vmem:[%s3868_s2] sm:$0xff]  ;;  %v2158_v2 = vmov 0   ;;  %v231_v3 = vld [vmem:[%s3868_s2 + $0x8] sm:$0x1f]  ;;  %v2159_v5 = vmov 1   ;;  %v2160_v6 = vmov 2   ;;  %v270_v7 = vlaneseq }
   0xf   : > { %v228_v1 = vld [vmem:[%s3867_s1] sm:$0xff]  ;;  %2129 = vset.pattern.permute.xlu1 %v2158_v2  ;;  %2128 = vset.pattern.permute.xlu0 %v2158_v2  ;;  %v229_v4 = vld [vmem:[%s3867_s1 + $0x8] sm:$0x1f]  ;;  %p191_p4 = scmp.lt.s32.totalorder %s2148_s12, 1  ;;  %vm1965_vm0 = vcmask 31744   ;;  %vm2001_vm1 = vcmask 28672  }
  0x10   : > { %234 = vperm.xlu1 %2129, %v230_v0   ;;  %244 = vperm.xlu0 %2128, %v228_v1   ;;  %v271_v8 = vshrl.u32 %v270_v7, 7 }
  0x11   : > { %s4419_s12 = smov (!%p191_p4, %s2148_s12), 1 }
  0x12   : > { %s2099_s24 = smul.u32 140, %s4419_s12  ;;  %v2223_v9 = vsub.s32 0, %v271_v8  ;;  %v2225_v10 = vsub.s32 4, %v271_v8  ;;  %v2239_v15 = vsub.s32 1, %v271_v8  ;;  %v2241_v16 = vsub.s32 5, %v271_v8 }
  0x13   : > { %v2251_v20 = vsub.s32 2, %v271_v8  ;;  %v2265_v26 = vsub.s32 6, %v271_v8  ;;  %s2100_s28 = smul.u32 560, %s4419_s12 }
  0x14   : > { %239 = vperm.xlu1 %2129, %v231_v3   ;;  %249 = vperm.xlu0 %2128, %v229_v4   ;;  %s2221_s27 = scalar_lea.vmem %s3866_s0, %s2099_s24 }
  0x15   : > { %v2228_v11 = vld [vmem:[%s2221_s27] sm:$0x77]  ;;  %v2231_v12 = vld [vmem:[%s2221_s27 + $0x8] sm:$0x77]  ;;  %v2234_v13 = vld [vmem:[%s2221_s27 + $0x10] sm:$0x77]  ;;  %s3258_s4 = scalar_lea.vmem %s3869_s3, %s2100_s28 }
  0x16   : > { %v2237_v14 = vld [vmem:[%s2221_s27 + $0x18] sm:$0x77]  ;;  %v2244_v17 = vld [vmem:[%s2221_s27 + $0x20] sm:$0x77]  ;;  %v2247_v18 = vld [vmem:[%s2221_s27 + $0x28] sm:$0x77]  ;;  %v273_v19 = vrot.slane %v2228_v11, %v2223_v9  ;;  %v277_v23 = vrot.slane %v2228_v11, %v2225_v10  ;;  %v281_v24 = vrot.slane %v2231_v12, %v2223_v9  ;;  %v285_v25 = vrot.slane %v2231_v12, %v2225_v10 }
  0x17   : > { %v2254_v21 = vld [vmem:[%s2221_s27 + $0x30] sm:$0x77]  ;;  %v2257_v22 = vld [vmem:[%s2221_s27 + $0x38] sm:$0x77]  ;;  %3979 = vst [vmem:[#allocation2_spill] sm:$0xff] %v2265_v26  ;;  %v289_v29 = vrot.slane %v2234_v13, %v2223_v9  ;;  %v293_v30 = vrot.slane %v2234_v13, %v2225_v10  ;;  %v297_v31 = vrot.slane %v2237_v14, %v2223_v9  ;;  %v301_v34 = vrot.slane %v2237_v14, %v2225_v10 }
  0x18   : > { %2131 = vset.pattern.permute.xlu1 %v2159_v5  ;;  %2130 = vset.pattern.permute.xlu0 %v2159_v5  ;;  %v2268_v27 = vld [vmem:[%s2221_s27 + $0x40] sm:$0x77]  ;;  %v2271_v28 = vld [vmem:[%s2221_s27 + $0x48] sm:$0x77]  ;;  %v2280_v32 = vld [vmem:[%s2221_s27 + $0x50] sm:$0x77]  ;;  %v305_v35 = vrot.slane %v2244_v17, %v2223_v9  ;;  %v309_v36 = vrot.slane %v2244_v17, %v2225_v10  ;;  %v313_v37 = vrot.slane %v2247_v18, %v2223_v9 }
  0x19   : > { %730 = vperm.xlu1 %2131, %v229_v4   ;;  %726 = vperm.xlu0 %2130, %v228_v1   ;;  %v2283_v33 = vld [vmem:[%s2221_s27 + $0x58] sm:$0x77]  ;;  %v2294_v38 = vld [vmem:[%s2221_s27 + $0x60] sm:$0x77]  ;;  %v2297_v39 = vld [vmem:[%s2221_s27 + $0x68] sm:$0x77]  ;;  %v317_v40 = vrot.slane %v2247_v18, %v2225_v10  ;;  %v321_v41 = vrot.slane %v2254_v21, %v2223_v9  ;;  %v325_v42 = vrot.slane %v2254_v21, %v2225_v10 }
  0x1a   : > { %v329_v43 = vrot.slane %v2257_v22, %v2223_v9  ;;  %v2308_v44 = vld [vmem:[%s2221_s27 + $0x70] sm:$0x77]  ;;  %v2311_v45 = vld [vmem:[%s2221_s27 + $0x78] sm:$0x77]  ;;  %v333_v46 = vrot.slane %v2257_v22, %v2225_v10  ;;  %v337_v47 = vrot.slane %v2268_v27, %v2223_v9  ;;  %v341_v48 = vrot.slane %v2268_v27, %v2225_v10  ;;  %v2322_v50 = vld [vmem:[%s2221_s27 + $0x80] sm:$0x77] }
  0x1b   : > { %v345_v49 = vrot.slane %v2271_v28, %v2223_v9  ;;  %v2325_v51 = vld [vmem:[%s2221_s27 + $0x88] sm:$0x7]  ;;  %v349_v52 = vrot.slane %v2271_v28, %v2225_v10  ;;  %v353_v53 = vrot.slane %v2280_v32, %v2223_v9  ;;  %v357_v54 = vrot.slane %v2280_v32, %v2225_v10 }
  0x1c   : > { %v361_v55 = vrot.slane %v2283_v33, %v2223_v9  ;;  %v365_v56 = vrot.slane %v2283_v33, %v2225_v10  ;;  %v369_v57 = vrot.slane %v2294_v38, %v2223_v9  ;;  %v373_v58 = vrot.slane %v2294_v38, %v2225_v10 }
  0x1d   : > { %2132 = vset.pattern.permute.xlu1 %v2160_v6  ;;  %2133 = vset.pattern.permute.xlu0 %v2160_v6  ;;  %v377_v59 = vrot.slane %v2297_v39, %v2223_v9  ;;  %v381_v60 = vrot.slane %v2297_v39, %v2225_v10  ;;  %v385_v61 = vrot.slane %v2308_v44, %v2223_v9 }
  0x1e   : > { %1189 = vperm.xlu1 %2132, %v228_v1   ;;  %1193 = vperm.xlu0 %2133, %v229_v4   ;;  %v389_v62 = vrot.slane %v2308_v44, %v2225_v10  ;;  %v393_v63 = vrot.slane %v2311_v45, %v2223_v9  ;;  %v397_v0 = vrot.slane %v2311_v45, %v2225_v10 }
  0x1f   : > { %v401_v1 = vrot.slane %v2322_v50, %v2223_v9  ;;  %v405_v2 = vrot.slane %v2322_v50, %v2225_v10  ;;  %v409_v3 = vrot.slane %v2325_v51, %v2223_v9  ;;  %v2360_v4 = vrot.slane %v273_v19, %v2223_v9 }
  0x20   : > { %v2363_v5 = vrot.slane %v277_v23, %v2223_v9  ;;  %v2366_v6 = vrot.slane %v281_v24, %v2223_v9  ;;  %v2369_v7 = vrot.slane %v285_v25, %v2223_v9  ;;  %v2372_v8 = vrot.slane %v289_v29, %v2223_v9 }
  0x21   : > { %3980 = vst [vmem:[#allocation3_spill] sm:$0xff] %v2360_v4  ;;  %v2375_v10 = vrot.slane %v293_v30, %v2223_v9  ;;  %v2378_v26 = vrot.slane %v297_v31, %v2223_v9  ;;  %v2381_v19 = vrot.slane %v301_v34, %v2223_v9  ;;  %v2384_v23 = vrot.slane %v305_v35, %v2223_v9 }
  0x22   : > { %3981 = vst [vmem:[#allocation4_spill] sm:$0xff] %v2363_v5  ;;  %3982 = vst [vmem:[#allocation5_spill] sm:$0xff] %v2366_v6  ;;  %v2387_v24 = vrot.slane %v309_v36, %v2223_v9  ;;  %v2390_v25 = vrot.slane %v313_v37, %v2223_v9  ;;  %v2393_v29 = vrot.slane %v317_v40, %v2223_v9 }
  0x23   : > { %3983 = vst [vmem:[#allocation6_spill] sm:$0xff] %v2369_v7  ;;  %3984 = vst [vmem:[#allocation7_spill] sm:$0xff] %v2372_v8  ;;  %v2396_v30 = vrot.slane %v321_v41, %v2223_v9  ;;  %v2399_v31 = vrot.slane %v325_v42, %v2223_v9  ;;  %v2402_v34 = vrot.slane %v329_v43, %v2223_v9 }
  0x24   : > { %3985 = vst [vmem:[#allocation8_spill] sm:$0xff] %v2375_v10  ;;  %3986 = vst [vmem:[#allocation9_spill] sm:$0xff] %v2378_v26  ;;  %v2405_v35 = vrot.slane %v333_v46, %v2223_v9  ;;  %v2408_v36 = vrot.slane %v337_v47, %v2223_v9  ;;  %v2411_v37 = vrot.slane %v341_v48, %v2223_v9 }
  0x25   : > { %3987 = vst [vmem:[#allocation10_spill] sm:$0xff] %v2381_v19  ;;  %3988 = vst [vmem:[#allocation11_spill] sm:$0xff] %v2384_v23  ;;  %v2414_v40 = vrot.slane %v345_v49, %v2223_v9  ;;  %v2417_v41 = vrot.slane %v349_v52, %v2223_v9  ;;  %v2420_v42 = vrot.slane %v353_v53, %v2223_v9 }
  0x26   : > { %3989 = vst [vmem:[#allocation12_spill] sm:$0xff] %v2387_v24  ;;  %3990 = vst [vmem:[#allocation13_spill] sm:$0xff] %v2390_v25  ;;  %v2423_v43 = vrot.slane %v357_v54, %v2223_v9  ;;  %v2426_v46 = vrot.slane %v361_v55, %v2223_v9  ;;  %v2429_v47 = vrot.slane %v365_v56, %v2223_v9 }
  0x27   : > { %3991 = vst [vmem:[#allocation14_spill] sm:$0xff] %v2393_v29  ;;  %3992 = vst [vmem:[#allocation15_spill] sm:$0xff] %v2396_v30  ;;  %v2432_v48 = vrot.slane %v369_v57, %v2223_v9  ;;  %v2435_v49 = vrot.slane %v373_v58, %v2223_v9  ;;  %v2438_v52 = vrot.slane %v377_v59, %v2223_v9 }
  0x28   : > { %3993 = vst [vmem:[#allocation16_spill] sm:$0xff] %v2399_v31  ;;  %3994 = vst [vmem:[#allocation17_spill] sm:$0xff] %v2402_v34  ;;  %v2441_v53 = vrot.slane %v381_v60, %v2223_v9  ;;  %v2444_v54 = vrot.slane %v385_v61, %v2223_v9  ;;  %v2447_v55 = vrot.slane %v389_v62, %v2223_v9 }
  0x29   : > { %3995 = vst [vmem:[#allocation18_spill] sm:$0xff] %v2405_v35  ;;  %3996 = vst [vmem:[#allocation19_spill] sm:$0xff] %v2408_v36  ;;  %v2450_v56 = vrot.slane %v393_v63, %v2223_v9  ;;  %v2453_v57 = vrot.slane %v397_v0, %v2223_v9  ;;  %v2456_v58 = vrot.slane %v401_v1, %v2223_v9 }
  0x2a   : > { %3997 = vst [vmem:[#allocation20_spill] sm:$0xff] %v2411_v37  ;;  %3998 = vst [vmem:[#allocation21_spill] sm:$0xff] %v2414_v40  ;;  %v2459_v59 = vrot.slane %v405_v2, %v2223_v9  ;;  %v2462_v60 = vrot.slane %v409_v3, %v2223_v9  ;;  %v736_v61 = vrot.slane %v2228_v11, %v2239_v15 }
  0x2b   : > { %3999 = vst [vmem:[#allocation22_spill] sm:$0xff] %v2417_v41  ;;  %4000 = vst [vmem:[#allocation23_spill] sm:$0xff] %v2420_v42  ;;  %v740_v62 = vrot.slane %v2228_v11, %v2241_v16  ;;  %v744_v63 = vrot.slane %v2231_v12, %v2239_v15  ;;  %v748_v0 = vrot.slane %v2231_v12, %v2241_v16 }
  0x2c   : > { %4001 = vst [vmem:[#allocation24_spill] sm:$0xff] %v2423_v43  ;;  %4002 = vst [vmem:[#allocation25_spill] sm:$0xff] %v2426_v46  ;;  %v752_v1 = vrot.slane %v2234_v13, %v2239_v15  ;;  %v756_v2 = vrot.slane %v2234_v13, %v2241_v16  ;;  %v760_v9 = vrot.slane %v2237_v14, %v2239_v15 }
  0x2d   : > { %4003 = vst [vmem:[#allocation26_spill] sm:$0xff] %v2429_v47  ;;  %4004 = vst [vmem:[#allocation27_spill] sm:$0xff] %v2432_v48  ;;  %v764_v3 = vrot.slane %v2237_v14, %v2241_v16  ;;  %v808_v48 = vrot.slane %v2271_v28, %v2239_v15  ;;  %v812_v47 = vrot.slane %v2271_v28, %v2241_v16 }
  0x2e   : > { %4005 = vst [vmem:[#allocation28_spill] sm:$0xff] %v2435_v49  ;;  %4006 = vst [vmem:[#allocation29_spill] sm:$0xff] %v2438_v52  ;;  %v800_v52 = vrot.slane %v2268_v27, %v2239_v15  ;;  %v804_v49 = vrot.slane %v2268_v27, %v2241_v16  ;;  %v816_v46 = vrot.slane %v2280_v32, %v2239_v15 }
  0x2f   : > { %4007 = vst [vmem:[#allocation30_spill] sm:$0xff] %v2441_v53  ;;  %4008 = vst [vmem:[#allocation31_spill] sm:$0xff] %v2444_v54  ;;  %v792_v54 = vrot.slane %v2257_v22, %v2239_v15  ;;  %v796_v53 = vrot.slane %v2257_v22, %v2241_v16  ;;  %v820_v43 = vrot.slane %v2280_v32, %v2241_v16 }
  0x30   : > { %4009 = vst [vmem:[#allocation32_spill] sm:$0xff] %v2447_v55  ;;  %4010 = vst [vmem:[#allocation33_spill] sm:$0xff] %v2450_v56  ;;  %v784_v56 = vrot.slane %v2254_v21, %v2239_v15  ;;  %v788_v55 = vrot.slane %v2254_v21, %v2241_v16  ;;  %v824_v42 = vrot.slane %v2283_v33, %v2239_v15 }
  0x31   : > { %4011 = vst [vmem:[#allocation34_spill] sm:$0xff] %v2453_v57  ;;  %4012 = vst [vmem:[#allocation35_spill] sm:$0xff] %v2456_v58  ;;  %v776_v58 = vrot.slane %v2247_v18, %v2239_v15  ;;  %v780_v57 = vrot.slane %v2247_v18, %v2241_v16  ;;  %v828_v41 = vrot.slane %v2283_v33, %v2241_v16 }
  0x32   : > { %4013 = vst [vmem:[#allocation36_spill] sm:$0xff] %v2459_v59  ;;  %4014 = vst [vmem:[#allocation37_spill] sm:$0xff] %v2462_v60  ;;  %v768_v60 = vrot.slane %v2244_v17, %v2239_v15  ;;  %v772_v59 = vrot.slane %v2244_v17, %v2241_v16  ;;  %v832_v40 = vrot.slane %v2294_v38, %v2239_v15 }
  0x33   : > { %v836_v37 = vrot.slane %v2294_v38, %v2241_v16  ;;  %v840_v36 = vrot.slane %v2297_v39, %v2239_v15  ;;  %v844_v35 = vrot.slane %v2297_v39, %v2241_v16  ;;  %v848_v34 = vrot.slane %v2308_v44, %v2239_v15 }
  0x34   : > { %v852_v31 = vrot.slane %v2308_v44, %v2241_v16  ;;  %v856_v30 = vrot.slane %v2311_v45, %v2239_v15  ;;  %v860_v29 = vrot.slane %v2311_v45, %v2241_v16  ;;  %v864_v25 = vrot.slane %v2322_v50, %v2239_v15 }
  0x35   : > { %v868_v24 = vrot.slane %v2322_v50, %v2241_v16  ;;  %v872_v23 = vrot.slane %v2325_v51, %v2239_v15  ;;  %v2535_v19 = vrot.slane %v736_v61, %v2239_v15  ;;  %v2538_v26 = vrot.slane %v740_v62, %v2239_v15 }
  0x36   : > { %v2541_v10 = vrot.slane %v744_v63, %v2239_v15  ;;  %v2544_v8 = vrot.slane %v748_v0, %v2239_v15  ;;  %v2547_v7 = vrot.slane %v752_v1, %v2239_v15  ;;  %v2550_v16 = vrot.slane %v756_v2, %v2239_v15 }
  0x37   : > { %4015 = vst [vmem:[#allocation38_spill] sm:$0xff] %v2535_v19  ;;  %4016 = vst [vmem:[#allocation39_spill] sm:$0xff] %v2538_v26  ;;  %v2553_v6 = vrot.slane %v760_v9, %v2239_v15  ;;  %v2556_v61 = vrot.slane %v764_v3, %v2239_v15  ;;  %v2559_v62 = vrot.slane %v768_v60, %v2239_v15 }
  0x38   : > { %4017 = vst [vmem:[#allocation40_spill] sm:$0xff] %v2541_v10  ;;  %4018 = vst [vmem:[#allocation41_spill] sm:$0xff] %v2544_v8  ;;  %v2562_v63 = vrot.slane %v772_v59, %v2239_v15  ;;  %v2565_v0 = vrot.slane %v776_v58, %v2239_v15  ;;  %v2568_v1 = vrot.slane %v780_v57, %v2239_v15 }
  0x39   : > { %4019 = vst [vmem:[#allocation42_spill] sm:$0xff] %v2547_v7  ;;  %4020 = vst [vmem:[#allocation43_spill] sm:$0xff] %v2550_v16  ;;  %v2571_v2 = vrot.slane %v784_v56, %v2239_v15  ;;  %v2574_v9 = vrot.slane %v788_v55, %v2239_v15  ;;  %v2577_v3 = vrot.slane %v792_v54, %v2239_v15 }
  0x3a   : > { %4021 = vst [vmem:[#allocation44_spill] sm:$0xff] %v2553_v6  ;;  %4022 = vst [vmem:[#allocation45_spill] sm:$0xff] %v2556_v61  ;;  %v2580_v60 = vrot.slane %v796_v53, %v2239_v15  ;;  %v2583_v59 = vrot.slane %v800_v52, %v2239_v15  ;;  %v2586_v58 = vrot.slane %v804_v49, %v2239_v15 }
  0x3b   : > { %4023 = vst [vmem:[#allocation46_spill] sm:$0xff] %v2559_v62  ;;  %4024 = vst [vmem:[#allocation47_spill] sm:$0xff] %v2562_v63  ;;  %v2589_v57 = vrot.slane %v808_v48, %v2239_v15  ;;  %v2592_v56 = vrot.slane %v812_v47, %v2239_v15  ;;  %v2595_v55 = vrot.slane %v816_v46, %v2239_v15 }
  0x3c   : > { %4025 = vst [vmem:[#allocation48_spill] sm:$0xff] %v2565_v0  ;;  %4026 = vst [vmem:[#allocation49_spill] sm:$0xff] %v2568_v1  ;;  %v2598_v54 = vrot.slane %v820_v43, %v2239_v15  ;;  %v2601_v53 = vrot.slane %v824_v42, %v2239_v15  ;;  %v2604_v52 = vrot.slane %v828_v41, %v2239_v15 }
  0x3d   : > { %4027 = vst [vmem:[#allocation50_spill] sm:$0xff] %v2571_v2  ;;  %4028 = vst [vmem:[#allocation51_spill] sm:$0xff] %v2574_v9  ;;  %v2607_v49 = vrot.slane %v832_v40, %v2239_v15  ;;  %v2610_v48 = vrot.slane %v836_v37, %v2239_v15  ;;  %v2613_v47 = vrot.slane %v840_v36, %v2239_v15 }
  0x3e   : > { %4029 = vst [vmem:[#allocation52_spill] sm:$0xff] %v2577_v3  ;;  %4030 = vst [vmem:[#allocation53_spill] sm:$0xff] %v2580_v60  ;;  %v2616_v46 = vrot.slane %v844_v35, %v2239_v15  ;;  %v2619_v43 = vrot.slane %v848_v34, %v2239_v15  ;;  %v2622_v42 = vrot.slane %v852_v31, %v2239_v15  ;;  %v4050_v31 = vld [vmem:[#allocation2_spill] sm:$0xff] }
  0x3f   : > { %4031 = vst [vmem:[#allocation54_spill] sm:$0xff] %v2583_v59  ;;  %4032 = vst [vmem:[#allocation55_spill] sm:$0xff] %v2586_v58  ;;  %v2625_v41 = vrot.slane %v856_v30, %v2239_v15  ;;  %v2628_v40 = vrot.slane %v860_v29, %v2239_v15  ;;  %v2631_v37 = vrot.slane %v864_v25, %v2239_v15 }
  0x40   : > { %4033 = vst [vmem:[#allocation56_spill] sm:$0xff] %v2589_v57  ;;  %4034 = vst [vmem:[#allocation57_spill] sm:$0xff] %v2592_v56  ;;  %v2634_v36 = vrot.slane %v868_v24, %v2239_v15  ;;  %v2637_v35 = vrot.slane %v872_v23, %v2239_v15  ;;  %v1199_v34 = vrot.slane %v2228_v11, %v2251_v20 }
  0x41   : > { %4035 = vst [vmem:[#allocation58_spill] sm:$0xff] %v2595_v55  ;;  %4036 = vst [vmem:[#allocation59_spill] sm:$0xff] %v2598_v54  ;;  %v1207_v30 = vrot.slane %v2231_v12, %v2251_v20  ;;  %v1211_v29 = vrot.slane %v2231_v12, %v4050_v31  ;;  %v1215_v25 = vrot.slane %v2234_v13, %v2251_v20 }
  0x42   : > { %4037 = vst [vmem:[#allocation60_spill] sm:$0xff] %v2601_v53  ;;  %4038 = vst [vmem:[#allocation61_spill] sm:$0xff] %v2604_v52  ;;  %v1219_v24 = vrot.slane %v2234_v13, %v4050_v31  ;;  %v1223_v15 = vrot.slane %v2237_v14, %v2251_v20  ;;  %v1227_v23 = vrot.slane %v2237_v14, %v4050_v31 }
  0x43   : > { %4039 = vst [vmem:[#allocation62_spill] sm:$0xff] %v2607_v49  ;;  %4040 = vst [vmem:[#allocation63_spill] sm:$0xff] %v2610_v48  ;;  %v1239_v12 = vrot.slane %v2247_v18, %v2251_v20  ;;  %v1247_v13 = vrot.slane %v2254_v21, %v2251_v20  ;;  %v1255_v14 = vrot.slane %v2257_v22, %v2251_v20 }
  0x44   : > { %4041 = vst [vmem:[#allocation64_spill] sm:$0xff] %v2613_v47  ;;  %4042 = vst [vmem:[#allocation65_spill] sm:$0xff] %v2616_v46  ;;  %v1283_v46 = vrot.slane %v2280_v32, %v4050_v31  ;;  %v1291_v47 = vrot.slane %v2283_v33, %v4050_v31  ;;  %v1299_v48 = vrot.slane %v2294_v38, %v4050_v31 }
  0x45   : > { %4043 = vst [vmem:[#allocation66_spill] sm:$0xff] %v2619_v43  ;;  %4044 = vst [vmem:[#allocation67_spill] sm:$0xff] %v2622_v42  ;;  %v1203_v42 = vrot.slane %v2228_v11, %v4050_v31  ;;  %v1231_v11 = vrot.slane %v2244_v17, %v2251_v20  ;;  %v1275_v43 = vrot.slane %v2271_v28, %v4050_v31 }
  0x46   : > { %4045 = vst [vmem:[#allocation68_spill] sm:$0xff] %v2625_v41  ;;  %4046 = vst [vmem:[#allocation69_spill] sm:$0xff] %v2628_v40  ;;  %v1259_v40 = vrot.slane %v2257_v22, %v4050_v31  ;;  %v1267_v41 = vrot.slane %v2268_v27, %v4050_v31  ;;  %v1287_v22 = vrot.slane %v2283_v33, %v2251_v20 }
  0x47   : > { %4047 = vst [vmem:[#allocation70_spill] sm:$0xff] %v2631_v37  ;;  %4048 = vst [vmem:[#allocation71_spill] sm:$0xff] %v2634_v36  ;;  %v1243_v36 = vrot.slane %v2247_v18, %v4050_v31  ;;  %v1251_v37 = vrot.slane %v2254_v21, %v4050_v31  ;;  %v1271_v18 = vrot.slane %v2271_v28, %v2251_v20 }
  0x48   : > { %4049 = vst [vmem:[#allocation72_spill] sm:$0xff] %v2637_v35  ;;  %v1235_v35 = vrot.slane %v2244_v17, %v4050_v31  ;;  %v1263_v17 = vrot.slane %v2268_v27, %v2251_v20  ;;  %v1279_v21 = vrot.slane %v2280_v32, %v2251_v20  ;;  %v1295_v27 = vrot.slane %v2294_v38, %v2251_v20 }
  0x49   : > { %v1303_v28 = vrot.slane %v2297_v39, %v2251_v20  ;;  %v1307_v49 = vrot.slane %v2297_v39, %v4050_v31  ;;  %v1311_v32 = vrot.slane %v2308_v44, %v2251_v20  ;;  %v1315_v52 = vrot.slane %v2308_v44, %v4050_v31 }
  0x4a   : > { %v1319_v33 = vrot.slane %v2311_v45, %v2251_v20  ;;  %v1323_v53 = vrot.slane %v2311_v45, %v4050_v31  ;;  %v1327_v38 = vrot.slane %v2322_v50, %v2251_v20  ;;  %v1331_v54 = vrot.slane %v2322_v50, %v4050_v31 }
  0x4b   : > { %v1335_v39 = vrot.slane %v2325_v51, %v2251_v20  ;;  %v2710_v55 = vrot.slane %v1199_v34, %v2251_v20  ;;  %v2713_v44 = vrot.slane %v1203_v42, %v2251_v20  ;;  %v2716_v56 = vrot.slane %v1207_v30, %v2251_v20 }
  0x4c   : > { %v2719_v45 = vrot.slane %v1211_v29, %v2251_v20  ;;  %v2722_v57 = vrot.slane %v1215_v25, %v2251_v20  ;;  %v2725_v50 = vrot.slane %v1219_v24, %v2251_v20  ;;  %v2728_v51 = vrot.slane %v1223_v15, %v2251_v20 }
  0x4d   : > { %4051 = vst [vmem:[#allocation2_spill] sm:$0xff] %v2710_v55  ;;  %4052 = vst [vmem:[#allocation73_spill] sm:$0xff] %v2713_v44  ;;  %v2731_v34 = vrot.slane %v1227_v23, %v2251_v20  ;;  %v2734_v42 = vrot.slane %v1231_v11, %v2251_v20  ;;  %v2737_v31 = vrot.slane %v1235_v35, %v2251_v20 }
  0x4e   : > { %4053 = vst [vmem:[#allocation74_spill] sm:$0xff] %v2716_v56  ;;  %4054 = vst [vmem:[#allocation75_spill] sm:$0xff] %v2719_v45  ;;  %v2740_v30 = vrot.slane %v1239_v12, %v2251_v20  ;;  %v2743_v29 = vrot.slane %v1243_v36, %v2251_v20  ;;  %v2746_v25 = vrot.slane %v1247_v13, %v2251_v20 }
  0x4f   : > { %4055 = vst [vmem:[#allocation76_spill] sm:$0xff] %v2722_v57  ;;  %4056 = vst [vmem:[#allocation77_spill] sm:$0xff] %v2725_v50  ;;  %v2749_v24 = vrot.slane %v1251_v37, %v2251_v20  ;;  %v2752_v15 = vrot.slane %v1255_v14, %v2251_v20  ;;  %v2755_v23 = vrot.slane %v1259_v40, %v2251_v20 }
  0x50   : > { %4057 = vst [vmem:[#allocation78_spill] sm:$0xff] %v2728_v51  ;;  %4058 = vst [vmem:[#allocation79_spill] sm:$0xff] %v2731_v34  ;;  %v2758_v35 = vrot.slane %v1263_v17, %v2251_v20  ;;  %v2761_v11 = vrot.slane %v1267_v41, %v2251_v20  ;;  %v2764_v36 = vrot.slane %v1271_v18, %v2251_v20  ;;  %v4111_v34 = vld [vmem:[#allocation30_spill] sm:$0xff]  ;;  %v4112_v51 = vld [vmem:[#allocation31_spill] sm:$0xff] }
  0x51   : > { %4059 = vst [vmem:[#allocation80_spill] sm:$0xff] %v2734_v42  ;;  %4060 = vst [vmem:[#allocation81_spill] sm:$0xff] %v2737_v31  ;;  %v2767_v12 = vrot.slane %v1275_v43, %v2251_v20  ;;  %v2770_v37 = vrot.slane %v1279_v21, %v2251_v20  ;;  %v2773_v13 = vrot.slane %v1283_v46, %v2251_v20  ;;  %v4109_v31 = vld [vmem:[#allocation28_spill] sm:$0xff]  ;;  %v4110_v42 = vld [vmem:[#allocation29_spill] sm:$0xff] }
  0x52   : > { %4061 = vst [vmem:[#allocation82_spill] sm:$0xff] %v2740_v30  ;;  %4062 = vst [vmem:[#allocation83_spill] sm:$0xff] %v2743_v29  ;;  %v2776_v40 = vrot.slane %v1287_v22, %v2251_v20  ;;  %v2779_v14 = vrot.slane %v1291_v47, %v2251_v20  ;;  %v2782_v17 = vrot.slane %v1295_v27, %v2251_v20  ;;  %v4107_v29 = vld [vmem:[#allocation26_spill] sm:$0xff]  ;;  %v4108_v30 = vld [vmem:[#allocation27_spill] sm:$0xff] }
  0x53   : > { %4063 = vst [vmem:[#allocation84_spill] sm:$0xff] %v2746_v25  ;;  %4064 = vst [vmem:[#allocation85_spill] sm:$0xff] %v2749_v24  ;;  %v2785_v18 = vrot.slane %v1299_v48, %v2251_v20  ;;  %v2788_v43 = vrot.slane %v1303_v28, %v2251_v20  ;;  %v2791_v21 = vrot.slane %v1307_v49, %v2251_v20  ;;  %v4105_v24 = vld [vmem:[#allocation24_spill] sm:$0xff]  ;;  %v4106_v25 = vld [vmem:[#allocation25_spill] sm:$0xff] }
  0x54   : > { %4065 = vst [vmem:[#allocation86_spill] sm:$0xff] %v2752_v15  ;;  %4066 = vst [vmem:[#allocation87_spill] sm:$0xff] %v2755_v23  ;;  %v2794_v46 = vrot.slane %v1311_v32, %v2251_v20  ;;  %v2797_v22 = vrot.slane %v1315_v52, %v2251_v20  ;;  %v2800_v47 = vrot.slane %v1319_v33, %v2251_v20  ;;  %v4087_v33 = vld [vmem:[#allocation6_spill] sm:$0xff]  ;;  %v4104_v15 = vld [vmem:[#allocation23_spill] sm:$0xff] }
  0x55   : > { %4067 = vst [vmem:[#allocation88_spill] sm:$0xff] %v2758_v35  ;;  %4068 = vst [vmem:[#allocation89_spill] sm:$0xff] %v2761_v11  ;;  %v2803_v27 = vrot.slane %v1323_v53, %v2251_v20  ;;  %v2807_v28 = vrot.slane %v1327_v38, %v2251_v20  ;;  %v2810_v49 = vrot.slane %v1331_v54, %v2251_v20  ;;  %v4091_v38 = vld [vmem:[#allocation10_spill] sm:$0xff]  ;;  %v4101_v11 = vld [vmem:[#allocation20_spill] sm:$0xff] }
  0x56   : > { %4069 = vst [vmem:[#allocation90_spill] sm:$0xff] %v2764_v36  ;;  %4070 = vst [vmem:[#allocation91_spill] sm:$0xff] %v2767_v12  ;;  %v2813_v32 = vrot.slane %v1335_v39, %v2251_v20  ;;  %v4094_v20 = vld [vmem:[#allocation13_spill] sm:$0xff]  ;;  %v4099_v12 = vld [vmem:[#allocation18_spill] sm:$0xff] }
  0x57   : > { %4071 = vst [vmem:[#allocation92_spill] sm:$0xff] %v2770_v37  ;;  %4072 = vst [vmem:[#allocation93_spill] sm:$0xff] %v2773_v13  ;;  %v4097_v13 = vld [vmem:[#allocation16_spill] sm:$0xff]  ;;  %v4098_v37 = vld [vmem:[#allocation17_spill] sm:$0xff] }
  0x58   : > { %4073 = vst [vmem:[#allocation94_spill] sm:$0xff] %v2776_v40  ;;  %4074 = vst [vmem:[#allocation95_spill] sm:$0xff] %v2779_v14  ;;  %v4096_v40 = vld [vmem:[#allocation15_spill] sm:$0xff]  ;;  %v4102_v35 = vld [vmem:[#allocation21_spill] sm:$0xff] }
  0x59   : > { %4075 = vst [vmem:[#allocation96_spill] sm:$0xff] %v2782_v17  ;;  %4076 = vst [vmem:[#allocation97_spill] sm:$0xff] %v2785_v18  ;;  %v4092_v17 = vld [vmem:[#allocation11_spill] sm:$0xff]  ;;  %v4103_v23 = vld [vmem:[#allocation22_spill] sm:$0xff] }
  0x5a   : > { %4077 = vst [vmem:[#allocation98_spill] sm:$0xff] %v2788_v43  ;;  %4078 = vst [vmem:[#allocation99_spill] sm:$0xff] %v2791_v21  ;;  %v4088_v21 = vld [vmem:[#allocation7_spill] sm:$0xff] }
  0x5b   : > { %4079 = vst [vmem:[#allocation100_spill] sm:$0xff] %v2794_v46  ;;  %4080 = vst [vmem:[#allocation101_spill] sm:$0xff] %v2797_v22  ;;  %v4086_v22 = vld [vmem:[#allocation5_spill] sm:$0xff]  ;;  %v4100_v36 = vld [vmem:[#allocation19_spill] sm:$0xff] }
  0x5c   : > { %4081 = vst [vmem:[#allocation102_spill] sm:$0xff] %v2800_v47  ;;  %4082 = vst [vmem:[#allocation103_spill] sm:$0xff] %v2803_v27  ;;  %v4089_v27 = vld [vmem:[#allocation8_spill] sm:$0xff] }
  0x5d   : > { %4083 = vst [vmem:[#allocation104_spill] sm:$0xff] %v2807_v28  ;;  %4084 = vst [vmem:[#allocation105_spill] sm:$0xff] %v2810_v49  ;;  %v4093_v49 = vld [vmem:[#allocation12_spill] sm:$0xff] }
  0x5e   : > { %4085 = vst [vmem:[#allocation106_spill] sm:$0xff] %v2813_v32  ;;  %v4095_v32 = vld [vmem:[#allocation14_spill] sm:$0xff] }
  0x8f   : > { %v245_v41 = vpop.permute.xlu0 %244  ;;  %v235_v50 = vpop.permute.xlu1 %234 }
  0x90   : > { %v585_v48 = vmul.f32 %v2360_v4, %v245_v41  ;;  %v586_v52 = vmul.f32 %v2363_v5, %v245_v41  ;;  %v587_v46 = vmul.f32 %v4086_v22, %v245_v41  ;;  %v588_v47 = vmul.f32 %v4087_v33, %v245_v41  ;;  %v4090_v4 = vld [vmem:[#allocation9_spill] sm:$0xff] }
  0x91   : > { %v589_v53 = vmul.f32 %v4088_v21, %v245_v41  ;;  %v590_v43 = vmul.f32 %v4089_v27, %v245_v41  ;;  %v591_v18 = vmul.f32 %v4090_v4, %v245_v41  ;;  %v592_v28 = vmul.f32 %v4091_v38, %v245_v41 }
  0x92   : > { %v593_v54 = vmul.f32 %v4092_v17, %v245_v41  ;;  %v594_v14 = vmul.f32 %v4093_v49, %v245_v41  ;;  %v595_v39 = vmul.f32 %v4094_v20, %v245_v41  ;;  %v596_v5 = vmul.f32 %v4095_v32, %v245_v41 }
  0x93   : > { %v597_v22 = vmul.f32 %v4096_v40, %v245_v41  ;;  %v598_v33 = vmul.f32 %v4097_v13, %v245_v41  ;;  %v599_v21 = vmul.f32 %v4098_v37, %v245_v41  ;;  %v600_v27 = vmul.f32 %v4099_v12, %v245_v41 }
  0x94   : > { %v601_v4 = vmul.f32 %v4100_v36, %v245_v41  ;;  %v602_v38 = vmul.f32 %v4101_v11, %v245_v41  ;;  %v603_v17 = vmul.f32 %v4102_v35, %v245_v41  ;;  %v604_v49 = vmul.f32 %v4103_v23, %v245_v41  ;;  %v4113_v23 = vld [vmem:[#allocation32_spill] sm:$0xff] }
  0x95   : > { %v605_v20 = vmul.f32 %v4104_v15, %v245_v41  ;;  %v606_v32 = vmul.f32 %v4105_v24, %v245_v41  ;;  %v607_v40 = vmul.f32 %v4106_v25, %v245_v41  ;;  %v608_v13 = vmul.f32 %v4107_v29, %v245_v41  ;;  %v4114_v15 = vld [vmem:[#allocation33_spill] sm:$0xff]  ;;  %v4115_v24 = vld [vmem:[#allocation34_spill] sm:$0xff]  ;;  %v4116_v25 = vld [vmem:[#allocation35_spill] sm:$0xff]  ;;  %v2847_v29 = vpop.permute.xlu0 %249 }
  0x96   : > { %v609_v37 = vmul.f32 %v4108_v30, %v245_v41  ;;  %v610_v12 = vmul.f32 %v4109_v31, %v245_v41  ;;  %v611_v36 = vmul.f32 %v4110_v42, %v245_v41  ;;  %v612_v11 = vmul.f32 %v4111_v34, %v245_v41  ;;  %4117 = vst [vmem:[#allocation107_spill] sm:$0xff] %v2847_v29  ;;  %v4118_v30 = vld [vmem:[#allocation36_spill] sm:$0xff]  ;;  %v4119_v31 = vld [vmem:[#allocation37_spill] sm:$0xff] }
  0x97   : > { %v613_v35 = vmul.f32 %v4112_v51, %v245_v41  ;;  %v614_v57 = vmul.f32 %v4113_v23, %v245_v41  ;;  %v615_v45 = vmul.f32 %v4114_v15, %v245_v41  ;;  %v616_v56 = vmul.f32 %v4115_v24, %v245_v41 }
  0x98   : > { %v617_v44 = vmul.f32 %v4116_v25, %v245_v41  ;;  %v618_v55 = vmul.f32 %v4118_v30, %v245_v41  ;;  %v619_v58 = vmul.f32 %v4119_v31, %v245_v41  ;;  %v2851_v42 = vadd.f32 %v585_v48, %v235_v50  ;;  %v4139_v31 = vld [vmem:[#allocation55_spill] sm:$0xff] }
  0x99   : > { %v2853_v34 = vadd.f32 %v586_v52, %v235_v50  ;;  %v2855_v51 = vadd.f32 %v587_v46, %v235_v50  ;;  %v2857_v59 = vadd.f32 %v588_v47, %v235_v50  ;;  %v2859_v23 = vadd.f32 %v589_v53, %v235_v50 }
  0x9a   : > { %v2861_v15 = vadd.f32 %v590_v43, %v235_v50  ;;  %v2863_v24 = vadd.f32 %v591_v18, %v235_v50  ;;  %v2865_v25 = vadd.f32 %v592_v28, %v235_v50  ;;  %v2867_v29 = vadd.f32 %v593_v54, %v235_v50 }
  0x9b   : > { %v2869_v30 = vadd.f32 %v594_v14, %v235_v50  ;;  %v2871_v41 = vadd.f32 %v595_v39, %v235_v50  ;;  %v2873_v48 = vadd.f32 %v596_v5, %v235_v50  ;;  %v2875_v46 = vadd.f32 %v597_v22, %v235_v50  ;;  %v727_v22 = vpop.permute.xlu0 %726 }
  0x9c   : > { %v2877_v47 = vadd.f32 %v598_v33, %v235_v50  ;;  %v2879_v52 = vadd.f32 %v599_v21, %v235_v50  ;;  %v2881_v43 = vadd.f32 %v600_v27, %v235_v50  ;;  %v2883_v18 = vadd.f32 %v601_v4, %v235_v50 }
  0x9d   : > { %v2885_v28 = vadd.f32 %v602_v38, %v235_v50  ;;  %v2887_v53 = vadd.f32 %v603_v17, %v235_v50  ;;  %v2889_v14 = vadd.f32 %v604_v49, %v235_v50  ;;  %v2891_v54 = vadd.f32 %v605_v20, %v235_v50 }
  0x9e   : > { %v2893_v5 = vadd.f32 %v606_v32, %v235_v50  ;;  %v2895_v39 = vadd.f32 %v607_v40, %v235_v50  ;;  %v2897_v33 = vadd.f32 %v608_v13, %v235_v50  ;;  %v2899_v21 = vadd.f32 %v609_v37, %v235_v50 }
  0x9f   : > { %4120 = vst [vmem:[#allocation108_spill] sm:$0xff] %v2887_v53  ;;  %4121 = vst [vmem:[#allocation109_spill] sm:$0xff] %v2889_v14  ;;  %v2901_v27 = vadd.f32 %v610_v12, %v235_v50  ;;  %v2903_v4 = vadd.f32 %v611_v36, %v235_v50  ;;  %v2905_v38 = vadd.f32 %v612_v11, %v235_v50  ;;  %v4156_v14 = vld [vmem:[#allocation71_spill] sm:$0xff]  ;;  %v4157_v53 = vld [vmem:[#allocation72_spill] sm:$0xff] }
  0xa0   : > { %4122 = vst [vmem:[#allocation110_spill] sm:$0xff] %v2891_v54  ;;  %4123 = vst [vmem:[#allocation111_spill] sm:$0xff] %v2893_v5  ;;  %v2907_v17 = vadd.f32 %v613_v35, %v235_v50  ;;  %v2909_v49 = vadd.f32 %v614_v57, %v235_v50  ;;  %v2911_v20 = vadd.f32 %v615_v45, %v235_v50  ;;  %v4155_v54 = vld [vmem:[#allocation70_spill] sm:$0xff] }
  0xa1   : > { %4124 = vst [vmem:[#allocation112_spill] sm:$0xff] %v2895_v39  ;;  %4125 = vst [vmem:[#allocation113_spill] sm:$0xff] %v2897_v33  ;;  %v2913_v32 = vadd.f32 %v616_v56, %v235_v50  ;;  %v2915_v40 = vadd.f32 %v617_v44, %v235_v50  ;;  %v2917_v13 = vadd.f32 %v618_v55, %v235_v50  ;;  %v2928_v44 = vpop.permute.xlu1 %239  ;;  %v4151_v33 = vld [vmem:[#allocation67_spill] sm:$0xff]  ;;  %v4152_v39 = vld [vmem:[#allocation68_spill] sm:$0xff] }
  0xa2   : > { %4126 = vst [vmem:[#allocation114_spill] sm:$0xff] %v2899_v21  ;;  %4127 = vst [vmem:[#allocation115_spill] sm:$0xff] %v2901_v27  ;;  %v2919_v37 = vadd.f32 %v619_v58, %v235_v50  ;;  %v1048_v12 = vmul.f32 %v2535_v19, %v727_v22  ;;  %v1049_v36 = vmul.f32 %v2538_v26, %v727_v22  ;;  %v4138_v19 = vld [vmem:[#allocation54_spill] sm:$0xff]  ;;  %v4149_v27 = vld [vmem:[#allocation65_spill] sm:$0xff] }
  0xa3   : > { %4128 = vst [vmem:[#allocation116_spill] sm:$0xff] %v2903_v4  ;;  %4129 = vst [vmem:[#allocation117_spill] sm:$0xff] %v2905_v38  ;;  %v1050_v11 = vmul.f32 %v2541_v10, %v727_v22  ;;  %v1051_v35 = vmul.f32 %v2544_v8, %v727_v22  ;;  %v1052_v57 = vmul.f32 %v2547_v7, %v727_v22  ;;  %v4147_v38 = vld [vmem:[#allocation63_spill] sm:$0xff]  ;;  %v4148_v4 = vld [vmem:[#allocation64_spill] sm:$0xff] }
  0xa4   : > { %4130 = vst [vmem:[#allocation118_spill] sm:$0xff] %v2907_v17  ;;  %4131 = vst [vmem:[#allocation119_spill] sm:$0xff] %v2909_v49  ;;  %v1053_v45 = vmul.f32 %v2550_v16, %v727_v22  ;;  %v1054_v56 = vmul.f32 %v2553_v6, %v727_v22  ;;  %v1055_v55 = vmul.f32 %v2556_v61, %v727_v22  ;;  %v4145_v49 = vld [vmem:[#allocation61_spill] sm:$0xff]  ;;  %v4146_v17 = vld [vmem:[#allocation62_spill] sm:$0xff] }
  0xa5   : > { %4132 = vst [vmem:[#allocation120_spill] sm:$0xff] %v2911_v20  ;;  %4133 = vst [vmem:[#allocation121_spill] sm:$0xff] %v2913_v32  ;;  %v1056_v58 = vmul.f32 %v2559_v62, %v727_v22  ;;  %v1057_v50 = vmul.f32 %v2562_v63, %v727_v22  ;;  %v1058_v26 = vmul.f32 %v2565_v0, %v727_v22  ;;  %v4143_v32 = vld [vmem:[#allocation59_spill] sm:$0xff]  ;;  %v4144_v20 = vld [vmem:[#allocation60_spill] sm:$0xff]  ;;  %v2954_v5 = vpop.permute.xlu1 %730 }
  0xa6   : > { %4134 = vst [vmem:[#allocation122_spill] sm:$0xff] %v2915_v40  ;;  %4135 = vst [vmem:[#allocation123_spill] sm:$0xff] %v2917_v13  ;;  %v1059_v10 = vmul.f32 %v2568_v1, %v727_v22  ;;  %v1060_v8 = vmul.f32 %v2571_v2, %v727_v22  ;;  %v1061_v7 = vmul.f32 %v2574_v9, %v727_v22  ;;  %v4141_v13 = vld [vmem:[#allocation57_spill] sm:$0xff]  ;;  %v4142_v40 = vld [vmem:[#allocation58_spill] sm:$0xff] }
  0xa7   : > { %4136 = vst [vmem:[#allocation124_spill] sm:$0xff] %v2919_v37  ;;  %4137 = vst [vmem:[#allocation125_spill] sm:$0xff] %v2928_v44  ;;  %v1062_v16 = vmul.f32 %v2577_v3, %v727_v22  ;;  %v1063_v6 = vmul.f32 %v2580_v60, %v727_v22  ;;  %v1064_v44 = vmul.f32 %v4138_v19, %v727_v22  ;;  %v4140_v37 = vld [vmem:[#allocation56_spill] sm:$0xff]  ;;  %v4150_v21 = vld [vmem:[#allocation66_spill] sm:$0xff] }
  0xa8   : > { %v1065_v61 = vmul.f32 %v4139_v31, %v727_v22  ;;  %v1066_v62 = vmul.f32 %v4140_v37, %v727_v22  ;;  %v1067_v63 = vmul.f32 %v4141_v13, %v727_v22  ;;  %v1068_v0 = vmul.f32 %v4142_v40, %v727_v22  ;;  %4153 = vst [vmem:[#allocation126_spill] sm:$0xff] %v2954_v5  ;;  %v4209_v5 = vld [vmem:[#allocation89_spill] sm:$0xff] }
  0xa9   : > { %v1069_v1 = vmul.f32 %v4143_v32, %v727_v22  ;;  %v1070_v2 = vmul.f32 %v4144_v20, %v727_v22  ;;  %v1071_v9 = vmul.f32 %v4145_v49, %v727_v22  ;;  %v1072_v3 = vmul.f32 %v4146_v17, %v727_v22  ;;  %v4154_v32 = vld [vmem:[#allocation69_spill] sm:$0xff] }
  0xaa   : > { %v1073_v60 = vmul.f32 %v4147_v38, %v727_v22  ;;  %v1074_v19 = vmul.f32 %v4148_v4, %v727_v22  ;;  %v1075_v31 = vmul.f32 %v4149_v27, %v727_v22  ;;  %v1076_v37 = vmul.f32 %v4150_v21, %v727_v22  ;;  %v4208_v21 = vld [vmem:[#allocation88_spill] sm:$0xff] }
  0xab   : > { %v1077_v13 = vmul.f32 %v4151_v33, %v727_v22  ;;  %v1078_v40 = vmul.f32 %v4152_v39, %v727_v22  ;;  %v1079_v20 = vmul.f32 %v4154_v32, %v727_v22  ;;  %v1080_v49 = vmul.f32 %v4155_v54, %v727_v22 }
  0xac   : > { %v1081_v17 = vmul.f32 %v4156_v14, %v727_v22  ;;  %v1082_v38 = vmul.f32 %v4157_v53, %v727_v22  ;;  %v2961_v4 = vadd.f32 %v1048_v12, %v2851_v42  ;;  %v2964_v27 = vadd.f32 %v1049_v36, %v2853_v34  ;;  %v4206_v53 = vld [vmem:[#allocation86_spill] sm:$0xff]  ;;  %v4207_v14 = vld [vmem:[#allocation87_spill] sm:$0xff] }
  0xad   : > { %v2967_v33 = vadd.f32 %v1050_v11, %v2855_v51  ;;  %v2970_v39 = vadd.f32 %v1051_v35, %v2857_v59  ;;  %v2973_v32 = vadd.f32 %v1052_v57, %v2859_v23  ;;  %v2976_v54 = vadd.f32 %v1053_v45, %v2861_v15 }
  0xae   : > { %v2979_v22 = vadd.f32 %v1054_v56, %v2863_v24  ;;  %v2982_v42 = vadd.f32 %v1055_v55, %v2865_v25  ;;  %v2985_v34 = vadd.f32 %v1056_v58, %v2867_v29  ;;  %v2988_v51 = vadd.f32 %v1057_v50, %v2869_v30 }
  0xaf   : > { %v2991_v59 = vadd.f32 %v1058_v26, %v2871_v41  ;;  %v2994_v23 = vadd.f32 %v1059_v10, %v2873_v48  ;;  %v2997_v15 = vadd.f32 %v1060_v8, %v2875_v46  ;;  %v3000_v24 = vadd.f32 %v1061_v7, %v2877_v47  ;;  %v4158_v10 = vld [vmem:[#allocation108_spill] sm:$0xff]  ;;  %v4160_v8 = vld [vmem:[#allocation109_spill] sm:$0xff]  ;;  %v1190_v7 = vpop.permute.xlu1 %1189  ;;  %v4162_v46 = vld [vmem:[#allocation110_spill] sm:$0xff] }
  0xb0   : > { %v3003_v25 = vadd.f32 %v1062_v16, %v2879_v52  ;;  %v3006_v29 = vadd.f32 %v1063_v6, %v2881_v43  ;;  %v3009_v30 = vadd.f32 %v1064_v44, %v2883_v18  ;;  %v3012_v26 = vadd.f32 %v1065_v61, %v2885_v28  ;;  %v4164_v16 = vld [vmem:[#allocation111_spill] sm:$0xff]  ;;  %v4166_v6 = vld [vmem:[#allocation112_spill] sm:$0xff]  ;;  %v4168_v18 = vld [vmem:[#allocation113_spill] sm:$0xff] }
  0xb1   : > { %v3015_v41 = vadd.f32 %v1066_v62, %v4158_v10  ;;  %v3018_v48 = vadd.f32 %v1067_v63, %v4160_v8  ;;  %v3021_v47 = vadd.f32 %v1068_v0, %v4162_v46  ;;  %v3024_v52 = vadd.f32 %v1069_v1, %v4164_v16  ;;  %v4170_v61 = vld [vmem:[#allocation114_spill] sm:$0xff]  ;;  %v4172_v62 = vld [vmem:[#allocation115_spill] sm:$0xff]  ;;  %v4174_v63 = vld [vmem:[#allocation116_spill] sm:$0xff] }
  0xb2   : > { %v3027_v43 = vadd.f32 %v1070_v2, %v4166_v6  ;;  %v3030_v12 = vadd.f32 %v1071_v9, %v4168_v18  ;;  %v3033_v28 = vadd.f32 %v1072_v3, %v4170_v61  ;;  %v3036_v36 = vadd.f32 %v1073_v60, %v4172_v62  ;;  %v4176_v0 = vld [vmem:[#allocation117_spill] sm:$0xff]  ;;  %v4178_v1 = vld [vmem:[#allocation118_spill] sm:$0xff]  ;;  %v4180_v2 = vld [vmem:[#allocation119_spill] sm:$0xff] }
  0xb3   : > { %4159 = vst [vmem:[#allocation108_spill] sm:$0xff] %v3015_v41  ;;  %4161 = vst [vmem:[#allocation109_spill] sm:$0xff] %v3018_v48  ;;  %v3039_v11 = vadd.f32 %v1074_v19, %v4174_v63  ;;  %v3042_v35 = vadd.f32 %v1075_v31, %v4176_v0  ;;  %v3045_v57 = vadd.f32 %v1076_v37, %v4178_v1  ;;  %v4182_v9 = vld [vmem:[#allocation120_spill] sm:$0xff]  ;;  %v4184_v3 = vld [vmem:[#allocation121_spill] sm:$0xff] }
  0xb4   : > { %4163 = vst [vmem:[#allocation110_spill] sm:$0xff] %v3021_v47  ;;  %4165 = vst [vmem:[#allocation111_spill] sm:$0xff] %v3024_v52  ;;  %v3048_v45 = vadd.f32 %v1077_v13, %v4180_v2  ;;  %v3051_v56 = vadd.f32 %v1078_v40, %v4182_v9  ;;  %v3054_v44 = vadd.f32 %v1079_v20, %v4184_v3  ;;  %v4186_v60 = vld [vmem:[#allocation122_spill] sm:$0xff]  ;;  %v4188_v19 = vld [vmem:[#allocation123_spill] sm:$0xff] }
  0xb5   : > { %4167 = vst [vmem:[#allocation112_spill] sm:$0xff] %v3027_v43  ;;  %4169 = vst [vmem:[#allocation113_spill] sm:$0xff] %v3030_v12  ;;  %v3057_v55 = vadd.f32 %v1080_v49, %v4186_v60  ;;  %v3060_v58 = vadd.f32 %v1081_v17, %v4188_v19  ;;  %v4190_v31 = vld [vmem:[#allocation124_spill] sm:$0xff]  ;;  %v4192_v37 = vld [vmem:[#allocation2_spill] sm:$0xff] }
  0xb6   : > { %4171 = vst [vmem:[#allocation114_spill] sm:$0xff] %v3033_v28  ;;  %4173 = vst [vmem:[#allocation115_spill] sm:$0xff] %v3036_v36  ;;  %v3063_v50 = vadd.f32 %v1082_v38, %v4190_v31  ;;  %v1511_v10 = vmul.f32 %v4192_v37, %v1190_v7  ;;  %v4193_v8 = vld [vmem:[#allocation73_spill] sm:$0xff]  ;;  %v4194_v46 = vld [vmem:[#allocation74_spill] sm:$0xff] }
  0xb7   : > { %4175 = vst [vmem:[#allocation116_spill] sm:$0xff] %v3039_v11  ;;  %4177 = vst [vmem:[#allocation117_spill] sm:$0xff] %v3042_v35  ;;  %v1512_v13 = vmul.f32 %v4193_v8, %v1190_v7  ;;  %v1513_v16 = vmul.f32 %v4194_v46, %v1190_v7  ;;  %v4195_v40 = vld [vmem:[#allocation75_spill] sm:$0xff]  ;;  %v4196_v18 = vld [vmem:[#allocation76_spill] sm:$0xff] }
  0xb8   : > { %4179 = vst [vmem:[#allocation118_spill] sm:$0xff] %v3045_v57  ;;  %4181 = vst [vmem:[#allocation119_spill] sm:$0xff] %v3048_v45  ;;  %v1514_v6 = vmul.f32 %v4195_v40, %v1190_v7  ;;  %v1515_v20 = vmul.f32 %v4196_v18, %v1190_v7  ;;  %v4197_v61 = vld [vmem:[#allocation77_spill] sm:$0xff]  ;;  %v4198_v49 = vld [vmem:[#allocation78_spill] sm:$0xff]  ;;  %v1525_v18 = vmul.f32 %v4206_v53, %v1190_v7 }
  0xb9   : > { %4183 = vst [vmem:[#allocation120_spill] sm:$0xff] %v3051_v56  ;;  %4185 = vst [vmem:[#allocation121_spill] sm:$0xff] %v3054_v44  ;;  %v1516_v62 = vmul.f32 %v4197_v61, %v1190_v7  ;;  %v1517_v63 = vmul.f32 %v4198_v49, %v1190_v7  ;;  %v4199_v0 = vld [vmem:[#allocation79_spill] sm:$0xff]  ;;  %v4200_v1 = vld [vmem:[#allocation80_spill] sm:$0xff]  ;;  %v1526_v61 = vmul.f32 %v4207_v14, %v1190_v7 }
  0xba   : > { %4187 = vst [vmem:[#allocation122_spill] sm:$0xff] %v3057_v55  ;;  %4189 = vst [vmem:[#allocation123_spill] sm:$0xff] %v3060_v58  ;;  %v1518_v17 = vmul.f32 %v4199_v0, %v1190_v7  ;;  %v1519_v2 = vmul.f32 %v4200_v1, %v1190_v7  ;;  %v4201_v38 = vld [vmem:[#allocation81_spill] sm:$0xff]  ;;  %v4202_v3 = vld [vmem:[#allocation82_spill] sm:$0xff]  ;;  %v1527_v49 = vmul.f32 %v4208_v21, %v1190_v7 }
  0xbb   : > { %4191 = vst [vmem:[#allocation124_spill] sm:$0xff] %v3063_v50  ;;  %v1520_v9 = vmul.f32 %v4201_v38, %v1190_v7  ;;  %v1521_v60 = vmul.f32 %v4202_v3, %v1190_v7  ;;  %v4203_v19 = vld [vmem:[#allocation83_spill] sm:$0xff]  ;;  %v4204_v8 = vld [vmem:[#allocation84_spill] sm:$0xff]  ;;  %v4205_v37 = vld [vmem:[#allocation85_spill] sm:$0xff]  ;;  %v1528_v0 = vmul.f32 %v4209_v5, %v1190_v7 }
  0xbc   : > { %v1522_v31 = vmul.f32 %v4203_v19, %v1190_v7  ;;  %v1523_v46 = vmul.f32 %v4204_v8, %v1190_v7  ;;  %v1524_v40 = vmul.f32 %v4205_v37, %v1190_v7  ;;  %v4210_v50 = vld [vmem:[#allocation90_spill] sm:$0xff]  ;;  %v4211_v58 = vld [vmem:[#allocation91_spill] sm:$0xff]  ;;  %v4212_v55 = vld [vmem:[#allocation92_spill] sm:$0xff] }
  0xbd   : > { %v1529_v1 = vmul.f32 %v4210_v50, %v1190_v7  ;;  %v1530_v38 = vmul.f32 %v4211_v58, %v1190_v7  ;;  %v1531_v3 = vmul.f32 %v4212_v55, %v1190_v7  ;;  %v4213_v44 = vld [vmem:[#allocation93_spill] sm:$0xff]  ;;  %v4214_v56 = vld [vmem:[#allocation94_spill] sm:$0xff]  ;;  %v4215_v45 = vld [vmem:[#allocation95_spill] sm:$0xff] }
  0xbe   : > { %v1532_v19 = vmul.f32 %v4213_v44, %v1190_v7  ;;  %v1533_v8 = vmul.f32 %v4214_v56, %v1190_v7  ;;  %v1534_v37 = vmul.f32 %v4215_v45, %v1190_v7  ;;  %v4216_v57 = vld [vmem:[#allocation96_spill] sm:$0xff]  ;;  %v4217_v35 = vld [vmem:[#allocation97_spill] sm:$0xff]  ;;  %v4218_v11 = vld [vmem:[#allocation98_spill] sm:$0xff] }
  0xbf   : > { %v1535_v53 = vmul.f32 %v4216_v57, %v1190_v7  ;;  %v1536_v14 = vmul.f32 %v4217_v35, %v1190_v7  ;;  %v1537_v21 = vmul.f32 %v4218_v11, %v1190_v7  ;;  %v4219_v36 = vld [vmem:[#allocation99_spill] sm:$0xff]  ;;  %v4220_v28 = vld [vmem:[#allocation100_spill] sm:$0xff]  ;;  %v4221_v12 = vld [vmem:[#allocation101_spill] sm:$0xff]  ;;  %v3101_v35 = vadd.f32 %v1511_v10, %v2961_v4 }
  0xc0   : > { %v1538_v5 = vmul.f32 %v4219_v36, %v1190_v7  ;;  %v1539_v50 = vmul.f32 %v4220_v28, %v1190_v7  ;;  %v1540_v58 = vmul.f32 %v4221_v12, %v1190_v7  ;;  %v4222_v43 = vld [vmem:[#allocation102_spill] sm:$0xff]  ;;  %v4223_v52 = vld [vmem:[#allocation103_spill] sm:$0xff]  ;;  %v4224_v47 = vld [vmem:[#allocation104_spill] sm:$0xff]  ;;  %v3104_v11 = vadd.f32 %v1512_v13, %v2964_v27 }
  0xc1   : > { %v1541_v55 = vmul.f32 %v4222_v43, %v1190_v7  ;;  %v1542_v44 = vmul.f32 %v4223_v52, %v1190_v7  ;;  %v1543_v56 = vmul.f32 %v4224_v47, %v1190_v7  ;;  %v4225_v48 = vld [vmem:[#allocation105_spill] sm:$0xff]  ;;  %v4226_v41 = vld [vmem:[#allocation106_spill] sm:$0xff]  ;;  %v3107_v28 = vadd.f32 %v1513_v16, %v2967_v33 }
  0xc2   : > { %v1544_v45 = vmul.f32 %v4225_v48, %v1190_v7  ;;  %v1545_v57 = vmul.f32 %v4226_v41, %v1190_v7  ;;  %v3110_v12 = vadd.f32 %v1514_v6, %v2970_v39  ;;  %v3113_v52 = vadd.f32 %v1515_v20, %v2973_v32  ;;  %v4234_v20 = vld [vmem:[#allocation115_spill] sm:$0xff] }
  0xc3   : > { %v3116_v47 = vadd.f32 %v1516_v62, %v2976_v54  ;;  %v3119_v7 = vadd.f32 %v1517_v63, %v2979_v22  ;;  %v3122_v4 = vadd.f32 %v1518_v17, %v2982_v42  ;;  %v3125_v27 = vadd.f32 %v1519_v2, %v2985_v34  ;;  %v4235_v62 = vld [vmem:[#allocation116_spill] sm:$0xff]  ;;  %v4236_v63 = vld [vmem:[#allocation117_spill] sm:$0xff]  ;;  %v4237_v17 = vld [vmem:[#allocation118_spill] sm:$0xff] }
  0xc4   : > { %v3128_v33 = vadd.f32 %v1520_v9, %v2988_v51  ;;  %v3131_v39 = vadd.f32 %v1521_v60, %v2991_v59  ;;  %v3134_v32 = vadd.f32 %v1522_v31, %v2994_v23  ;;  %v3137_v54 = vadd.f32 %v1523_v46, %v2997_v15  ;;  %v4227_v23 = vld [vmem:[#allocation108_spill] sm:$0xff]  ;;  %v4228_v15 = vld [vmem:[#allocation109_spill] sm:$0xff] }
  0xc5   : > { %v3140_v22 = vadd.f32 %v1524_v40, %v3000_v24  ;;  %v3143_v42 = vadd.f32 %v1525_v18, %v3003_v25  ;;  %v3146_v34 = vadd.f32 %v1526_v61, %v3006_v29  ;;  %v3149_v51 = vadd.f32 %v1527_v49, %v3009_v30  ;;  %v4229_v24 = vld [vmem:[#allocation110_spill] sm:$0xff]  ;;  %v4230_v25 = vld [vmem:[#allocation111_spill] sm:$0xff]  ;;  %v4231_v29 = vld [vmem:[#allocation112_spill] sm:$0xff] }
  0xc6   : > { %v3152_v59 = vadd.f32 %v1528_v0, %v3012_v26  ;;  %v3155_v10 = vadd.f32 %v1529_v1, %v4227_v23  ;;  %v3158_v13 = vadd.f32 %v1530_v38, %v4228_v15  ;;  %v3161_v46 = vadd.f32 %v1531_v3, %v4229_v24  ;;  %v4232_v30 = vld [vmem:[#allocation113_spill] sm:$0xff]  ;;  %v4233_v26 = vld [vmem:[#allocation114_spill] sm:$0xff] }
  0xc7   : > { %v3164_v16 = vadd.f32 %v1532_v19, %v4230_v25  ;;  %v3167_v40 = vadd.f32 %v1533_v8, %v4231_v29  ;;  %v3170_v6 = vadd.f32 %v1534_v37, %v4232_v30  ;;  %v3173_v18 = vadd.f32 %v1535_v53, %v4233_v26  ;;  %v4238_v8 = vld [vmem:[#allocation119_spill] sm:$0xff]  ;;  %v4239_v37 = vld [vmem:[#allocation120_spill] sm:$0xff]  ;;  %v4240_v53 = vld [vmem:[#allocation121_spill] sm:$0xff] }
  0xc8   : > { %v3176_v61 = vadd.f32 %v1536_v14, %v4234_v20  ;;  %v3179_v49 = vadd.f32 %v1537_v21, %v4235_v62  ;;  %v3182_v0 = vadd.f32 %v1538_v5, %v4236_v63  ;;  %v3185_v1 = vadd.f32 %v1539_v50, %v4237_v17  ;;  %v4241_v14 = vld [vmem:[#allocation122_spill] sm:$0xff]  ;;  %v4242_v21 = vld [vmem:[#allocation123_spill] sm:$0xff]  ;;  %v4243_v5 = vld [vmem:[#allocation124_spill] sm:$0xff] }
  0xc9   : > { %v3188_v2 = vadd.f32 %v1540_v58, %v4238_v8  ;;  %v3191_v38 = vadd.f32 %v1541_v55, %v4239_v37  ;;  %v3194_v9 = vadd.f32 %v1542_v44, %v4240_v53  ;;  %v3197_v3 = vadd.f32 %v1543_v56, %v4241_v14 }
  0xca   : > { %v3200_v60 = vadd.f32 %v1544_v45, %v4242_v21  ;;  %v3203_v19 = vadd.f32 %v1545_v57, %v4243_v5  ;;  %v1651_v50 = vmin.f32 %v3101_v35, 6.0  ;;  %v1652_v58 = vmin.f32 %v3104_v11, 6.0 }
  0xcb   : > { %v1653_v31 = vmin.f32 %v3107_v28, 6.0  ;;  %v1654_v55 = vmin.f32 %v3110_v12, 6.0  ;;  %v1655_v44 = vmin.f32 %v3113_v52, 6.0  ;;  %v1656_v23 = vmin.f32 %v3116_v47, 6.0 }
  0xcc   : > { %v1657_v56 = vmin.f32 %v3119_v7, 6.0  ;;  %v1658_v45 = vmin.f32 %v3122_v4, 6.0  ;;  %v1659_v15 = vmin.f32 %v3125_v27, 6.0  ;;  %v1660_v57 = vmin.f32 %v3128_v33, 6.0 }
  0xcd   : > { %v1661_v35 = vmin.f32 %v3131_v39, 6.0  ;;  %v1662_v11 = vmin.f32 %v3134_v32, 6.0  ;;  %v1663_v28 = vmin.f32 %v3137_v54, 6.0  ;;  %v1664_v12 = vmin.f32 %v3140_v22, 6.0 }
  0xce   : > { %v1665_v52 = vmin.f32 %v3143_v42, 6.0  ;;  %v1666_v47 = vmin.f32 %v3146_v34, 6.0  ;;  %v1667_v7 = vmin.f32 %v3149_v51, 6.0  ;;  %v1668_v4 = vmin.f32 %v3152_v59, 6.0 }
  0xcf   : > { %v1669_v27 = vmin.f32 %v3155_v10, 6.0  ;;  %v1670_v33 = vmin.f32 %v3158_v13, 6.0  ;;  %v1671_v39 = vmin.f32 %v3161_v46, 6.0  ;;  %v1672_v32 = vmin.f32 %v3164_v16, 6.0 }
  0xd0   : > { %v1673_v54 = vmin.f32 %v3167_v40, 6.0  ;;  %v1674_v22 = vmin.f32 %v3170_v6, 6.0  ;;  %v1675_v42 = vmin.f32 %v3173_v18, 6.0  ;;  %v1676_v34 = vmin.f32 %v3176_v61, 6.0 }
  0xd1   : > { %v1677_v51 = vmin.f32 %v3179_v49, 6.0  ;;  %v1678_v59 = vmin.f32 %v3182_v0, 6.0  ;;  %v1679_v10 = vmin.f32 %v3185_v1, 6.0  ;;  %v1680_v13 = vmin.f32 %v3188_v2, 6.0 }
  0xd2   : > { %v1681_v24 = vmin.f32 %v3191_v38, 6.0  ;;  %v1682_v46 = vmin.f32 %v3194_v9, 6.0  ;;  %v1683_v25 = vmin.f32 %v3197_v3, 6.0  ;;  %v1684_v16 = vmin.f32 %v3200_v60, 6.0 }
  0xd3   : > { %v1685_v29 = vmin.f32 %v3203_v19, 6.0  ;;  %v1721_v40 = vmul.f32 %v1651_v50, %v1651_v50  ;;  %v1722_v30 = vmul.f32 %v1652_v58, %v1652_v58  ;;  %v1723_v6 = vmul.f32 %v1653_v31, %v1653_v31 }
  0xd4   : > { %v1724_v26 = vmul.f32 %v1654_v55, %v1654_v55  ;;  %v1725_v18 = vmul.f32 %v1655_v44, %v1655_v44  ;;  %v1726_v20 = vmul.f32 %v1656_v23, %v1656_v23  ;;  %v1727_v61 = vmul.f32 %v1657_v56, %v1657_v56 }
  0xd5   : > { %v1728_v62 = vmul.f32 %v1658_v45, %v1658_v45  ;;  %v1729_v49 = vmul.f32 %v1659_v15, %v1659_v15  ;;  %v1730_v63 = vmul.f32 %v1660_v57, %v1660_v57  ;;  %v1731_v0 = vmul.f32 %v1661_v35, %v1661_v35 }
  0xd6   : > { %v1732_v17 = vmul.f32 %v1662_v11, %v1662_v11  ;;  %v1733_v1 = vmul.f32 %v1663_v28, %v1663_v28  ;;  %v1734_v8 = vmul.f32 %v1664_v12, %v1664_v12  ;;  %v1735_v2 = vmul.f32 %v1665_v52, %v1665_v52 }
  0xd7   : > { %v1736_v37 = vmul.f32 %v1666_v47, %v1666_v47  ;;  %v1737_v38 = vmul.f32 %v1667_v7, %v1667_v7  ;;  %v1738_v53 = vmul.f32 %v1668_v4, %v1668_v4  ;;  %v1739_v9 = vmul.f32 %v1669_v27, %v1669_v27 }
  0xd8   : > { %v1740_v14 = vmul.f32 %v1670_v33, %v1670_v33  ;;  %v1741_v3 = vmul.f32 %v1671_v39, %v1671_v39  ;;  %v1742_v21 = vmul.f32 %v1672_v32, %v1672_v32  ;;  %v1743_v60 = vmul.f32 %v1673_v54, %v1673_v54 }
  0xd9   : > { %v1744_v5 = vmul.f32 %v1674_v22, %v1674_v22  ;;  %v1745_v19 = vmul.f32 %v1675_v42, %v1675_v42  ;;  %v1746_v50 = vmul.f32 %v1676_v34, %v1676_v34  ;;  %v1747_v58 = vmul.f32 %v1677_v51, %v1677_v51 }
  0xda   : > { %v1748_v31 = vmul.f32 %v1678_v59, %v1678_v59  ;;  %v1749_v55 = vmul.f32 %v1679_v10, %v1679_v10  ;;  %v1791_v44 = vmul.f32 0.16666667, %v1721_v40  ;;  %v1792_v23 = vmul.f32 0.16666667, %v1722_v30 }
  0xdb   : > { %v1793_v56 = vmul.f32 0.16666667, %v1723_v6  ;;  %v1750_v45 = vmul.f32 %v1680_v13, %v1680_v13  ;;  %v1794_v15 = vmul.f32 0.16666667, %v1724_v26  ;;  %v1795_v57 = vmul.f32 0.16666667, %v1725_v18 }
  0xdc   : > { %v1796_v35 = vmul.f32 0.16666667, %v1726_v20  ;;  %v1751_v11 = vmul.f32 %v1681_v24, %v1681_v24  ;;  %v1797_v28 = vmul.f32 0.16666667, %v1727_v61  ;;  %v1798_v12 = vmul.f32 0.16666667, %v1728_v62 }
  0xdd   : > { %v1799_v52 = vmul.f32 0.16666667, %v1729_v49  ;;  %v1752_v47 = vmul.f32 %v1682_v46, %v1682_v46  ;;  %v1800_v7 = vmul.f32 0.16666667, %v1730_v63  ;;  %v1801_v4 = vmul.f32 0.16666667, %v1731_v0 }
  0xde   : > { %v1802_v27 = vmul.f32 0.16666667, %v1732_v17  ;;  %v1753_v33 = vmul.f32 %v1683_v25, %v1683_v25  ;;  %v1803_v39 = vmul.f32 0.16666667, %v1733_v1  ;;  %v1804_v32 = vmul.f32 0.16666667, %v1734_v8 }
  0xdf   : > { %v1805_v54 = vmul.f32 0.16666667, %v1735_v2  ;;  %v1754_v22 = vmul.f32 %v1684_v16, %v1684_v16  ;;  %v1806_v42 = vmul.f32 0.16666667, %v1736_v37  ;;  %v1807_v34 = vmul.f32 0.16666667, %v1737_v38 }
  0xe0   : > { %v1808_v51 = vmul.f32 0.16666667, %v1738_v53  ;;  %v1755_v59 = vmul.f32 %v1685_v29, %v1685_v29  ;;  %v1809_v10 = vmul.f32 0.16666667, %v1739_v9  ;;  %v1810_v13 = vmul.f32 0.16666667, %v1740_v14 }
  0xe1   : > { %v1811_v24 = vmul.f32 0.16666667, %v1741_v3  ;;  %v1812_v40 = vmul.f32 0.16666667, %v1742_v21  ;;  %v1813_v30 = vmul.f32 0.16666667, %v1743_v60 }
  0xe2   : > { %v1814_v6 = vmul.f32 0.16666667, %v1744_v5  ;;  %v4244_v46 = vld [vmem:[#allocation107_spill] sm:$0xff]  ;;  %v1815_v25 = vmul.f32 0.16666667, %v1745_v19  ;;  %v4246_v16 = vld [vmem:[#allocation4_spill] sm:$0xff] }
  0xe3   : > { %v4245_v26 = vld [vmem:[#allocation3_spill] sm:$0xff]  ;;  %v1816_v20 = vmul.f32 0.16666667, %v1746_v50  ;;  %v1817_v61 = vmul.f32 0.16666667, %v1747_v58  ;;  %v3247_v62 = vmul.f32 %v4246_v16, %v4244_v46  ;;  %v4247_v0 = vld [vmem:[#allocation5_spill] sm:$0xff] }
  0xe4   : > { %v3243_v18 = vmul.f32 %v4245_v26, %v4244_v46  ;;  %v1818_v49 = vmul.f32 0.16666667, %v1748_v31  ;;  %v1819_v29 = vmul.f32 0.16666667, %v1749_v55  ;;  %v1820_v63 = vmul.f32 0.16666667, %v1750_v45 }
  0xe5   : > { %v3251_v17 = vmul.f32 %v4247_v0, %v4244_v46  ;;  %v1821_v1 = vmul.f32 0.16666667, %v1751_v11  ;;  %v1822_v8 = vmul.f32 0.16666667, %v1752_v47  ;;  %v1823_v2 = vmul.f32 0.16666667, %v1753_v33 }
  0xe6   : > { %v4248_v37 = vld [vmem:[#allocation6_spill] sm:$0xff]  ;;  %v1824_v53 = vmul.f32 0.16666667, %v1754_v22  ;;  %v1825_v9 = vmul.f32 0.16666667, %v1755_v59  ;;  %v1861_v14 = vadd.f32 6.0, %v1791_v44 }
  0xe7   : > { %v3262_v38 = vmul.f32 %v4248_v37, %v4244_v46  ;;  %v1862_v3 = vadd.f32 6.0, %v1792_v23  ;;  %v1863_v21 = vadd.f32 6.0, %v1793_v56  ;;  %v1864_v60 = vadd.f32 6.0, %v1794_v15 }
  0xe8   : > { %v1865_v5 = vadd.f32 6.0, %v1795_v57  ;;  %v1866_v19 = vadd.f32 6.0, %v1796_v35  ;;  %v1867_v50 = vadd.f32 6.0, %v1797_v28  ;;  %v1868_v58 = vadd.f32 6.0, %v1798_v12  ;;  %1931 = vst [vmem:[%s3258_s4] sm:$0xff] %v1861_v14  ;;  %v4259_v14 = vld [vmem:[#allocation17_spill] sm:$0xff] }
  0xe9   : > { %v1869_v31 = vadd.f32 6.0, %v1799_v52  ;;  %v1870_v55 = vadd.f32 6.0, %v1800_v7  ;;  %1932 = vst [vmem:[%s3258_s4 + $0x8] sm:$0xff] %v1862_v3  ;;  %v1871_v44 = vadd.f32 6.0, %v1801_v4  ;;  %v1872_v45 = vadd.f32 6.0, %v1802_v27  ;;  %1933 = vst [vmem:[%s3258_s4 + $0x10] sm:$0xff] %v1863_v21 }
  0xea   : > { %v1873_v23 = vadd.f32 6.0, %v1803_v39  ;;  %v1874_v11 = vadd.f32 6.0, %v1804_v32  ;;  %1934 = vst [vmem:[%s3258_s4 + $0x18] sm:$0xff] %v1864_v60  ;;  %1935 = vst [vmem:[%s3258_s4 + $0x20] sm:$0xff] %v1865_v5  ;;  %v1875_v56 = vadd.f32 6.0, %v1805_v54  ;;  %v1876_v15 = vadd.f32 6.0, %v1806_v42 }
  0xeb   : > { %1936 = vst [vmem:[%s3258_s4 + $0x28] sm:$0xff] %v1866_v19  ;;  %v1877_v57 = vadd.f32 6.0, %v1807_v34  ;;  %v1878_v35 = vadd.f32 6.0, %v1808_v51  ;;  %1937 = vst [vmem:[%s3258_s4 + $0x30] sm:$0xff] %v1867_v50  ;;  %v1879_v28 = vadd.f32 6.0, %v1809_v10  ;;  %v1880_v12 = vadd.f32 6.0, %v1810_v13 }
  0xec   : > { %1938 = vst [vmem:[%s3258_s4 + $0x38] sm:$0xff] %v1868_v58  ;;  %1939 = vst [vmem:[%s3258_s4 + $0x40] sm:$0xff] %v1869_v31  ;;  %v1881_v52 = vadd.f32 6.0, %v1811_v24  ;;  %v1882_v47 = vadd.f32 6.0, %v1812_v40  ;;  %v1883_v7 = vadd.f32 6.0, %v1813_v30  ;;  %v1884_v4 = vadd.f32 6.0, %v1814_v6 }
  0xed   : > { %1940 = vst [vmem:[%s3258_s4 + $0x48] sm:$0xff] %v1870_v55  ;;  %1941 = vst [vmem:[%s3258_s4 + $0x50] sm:$0xff] %v1871_v44  ;;  %v1885_v27 = vadd.f32 6.0, %v1815_v25  ;;  %v1886_v33 = vadd.f32 6.0, %v1816_v20  ;;  %v1887_v39 = vadd.f32 6.0, %v1817_v61  ;;  %v1888_v32 = vadd.f32 6.0, %v1818_v49 }
  0xee   : > { %1942 = vst [vmem:[%s3258_s4 + $0x58] sm:$0xff] %v1872_v45  ;;  %1943 = vst [vmem:[%s3258_s4 + $0x60] sm:$0xff] %v1873_v23  ;;  %v1889_v54 = vadd.f32 6.0, %v1819_v29  ;;  %v1890_v22 = vadd.f32 6.0, %v1820_v63  ;;  %v1891_v42 = vadd.f32 6.0, %v1821_v1  ;;  %v1892_v34 = vadd.f32 6.0, %v1822_v8 }
  0xef   : > { %1944 = vst [vmem:[%s3258_s4 + $0x68] sm:$0xff] %v1874_v11  ;;  %1945 = vst [vmem:[%s3258_s4 + $0x70] sm:$0xff] %v1875_v56  ;;  %v1893_v51 = vadd.f32 6.0, %v1823_v2  ;;  %v1894_v59 = vadd.f32 6.0, %v1824_v53  ;;  %v1895_v10 = vadd.f32 6.0, %v1825_v9  ;;  %v4249_v13 = vld [vmem:[#allocation7_spill] sm:$0xff]  ;;  %v634_v3 = vmul.f32 %v4259_v14, %v4244_v46 }
  0xf0   : > { %1946 = vst [vmem:[%s3258_s4 + $0x78] sm:$0xff] %v1876_v15  ;;  %1947 = vst [vmem:[%s3258_s4 + $0x80] sm:$0xff] %v1877_v57  ;;  %v624_v24 = vmul.f32 %v4249_v13, %v4244_v46  ;;  %v4250_v40 = vld [vmem:[#allocation8_spill] sm:$0xff]  ;;  %v4251_v6 = vld [vmem:[#allocation9_spill] sm:$0xff] }
  0xf1   : > { %1948 = vst [vmem:[%s3258_s4 + $0x88] sm:$0xff] %v1878_v35  ;;  %1949 = vst [vmem:[%s3258_s4 + $0x90] sm:$0xff] %v1879_v28  ;;  %v625_v30 = vmul.f32 %v4250_v40, %v4244_v46  ;;  %v626_v26 = vmul.f32 %v4251_v6, %v4244_v46  ;;  %v4252_v25 = vld [vmem:[#allocation10_spill] sm:$0xff]  ;;  %v4253_v61 = vld [vmem:[#allocation11_spill] sm:$0xff] }
  0xf2   : > { %1950 = vst [vmem:[%s3258_s4 + $0x98] sm:$0xff] %v1880_v12  ;;  %1951 = vst [vmem:[%s3258_s4 + $0xa0] sm:$0xff] %v1881_v52  ;;  %v627_v20 = vmul.f32 %v4252_v25, %v4244_v46  ;;  %v628_v16 = vmul.f32 %v4253_v61, %v4244_v46  ;;  %v4254_v49 = vld [vmem:[#allocation12_spill] sm:$0xff]  ;;  %v4255_v63 = vld [vmem:[#allocation13_spill] sm:$0xff] }
  0xf3   : > { %1952 = vst [vmem:[%s3258_s4 + $0xa8] sm:$0xff] %v1882_v47  ;;  %1953 = vst [vmem:[%s3258_s4 + $0xb0] sm:$0xff] %v1883_v7  ;;  %v629_v29 = vmul.f32 %v4254_v49, %v4244_v46  ;;  %v630_v0 = vmul.f32 %v4255_v63, %v4244_v46  ;;  %v4256_v1 = vld [vmem:[#allocation14_spill] sm:$0xff]  ;;  %v4257_v2 = vld [vmem:[#allocation15_spill] sm:$0xff] }
  0xf4   : > { %1954 = vst [vmem:[%s3258_s4 + $0xb8] sm:$0xff] %v1884_v4  ;;  %1955 = vst [vmem:[%s3258_s4 + $0xc0] sm:$0xff] %v1885_v27  ;;  %v631_v8 = vmul.f32 %v4256_v1, %v4244_v46  ;;  %v632_v37 = vmul.f32 %v4257_v2, %v4244_v46  ;;  %v4258_v53 = vld [vmem:[#allocation16_spill] sm:$0xff]  ;;  %v4260_v21 = vld [vmem:[#allocation18_spill] sm:$0xff] }
  0xf5   : > { %1956 = vst [vmem:[%s3258_s4 + $0xc8] sm:$0xff] %v1886_v33  ;;  %1957 = vst [vmem:[%s3258_s4 + $0xd0] sm:$0xff] %v1887_v39  ;;  %v633_v9 = vmul.f32 %v4258_v53, %v4244_v46  ;;  %v635_v60 = vmul.f32 %v4260_v21, %v4244_v46  ;;  %v4261_v5 = vld [vmem:[#allocation19_spill] sm:$0xff]  ;;  %v4262_v50 = vld [vmem:[#allocation20_spill] sm:$0xff] }
  0xf6   : > { %1958 = vst [vmem:[%s3258_s4 + $0xd8] sm:$0xff] %v1888_v32  ;;  %1959 = vst [vmem:[%s3258_s4 + $0xe0] sm:$0xff] %v1889_v54  ;;  %v636_v19 = vmul.f32 %v4261_v5, %v4244_v46  ;;  %v637_v58 = vmul.f32 %v4262_v50, %v4244_v46  ;;  %v4263_v31 = vld [vmem:[#allocation21_spill] sm:$0xff]  ;;  %v4264_v44 = vld [vmem:[#allocation22_spill] sm:$0xff] }
  0xf7   : > { %1960 = vst [vmem:[%s3258_s4 + $0xe8] sm:$0xff] %v1890_v22  ;;  %1961 = vst [vmem:[%s3258_s4 + $0xf0] sm:$0xff] %v1891_v42  ;;  %v638_v55 = vmul.f32 %v4263_v31, %v4244_v46  ;;  %v639_v45 = vmul.f32 %v4264_v44, %v4244_v46  ;;  %v4265_v23 = vld [vmem:[#allocation23_spill] sm:$0xff]  ;;  %v4266_v56 = vld [vmem:[#allocation24_spill] sm:$0xff] }
  0xf8   : > { %1962 = vst [vmem:[%s3258_s4 + $0xf8] sm:$0xff] %v1892_v34  ;;  %1963 = vst [vmem:[%s3258_s4 + $0x100] sm:$0xff] %v1893_v51  ;;  %v640_v11 = vmul.f32 %v4265_v23, %v4244_v46  ;;  %v641_v15 = vmul.f32 %v4266_v56, %v4244_v46  ;;  %v4267_v57 = vld [vmem:[#allocation25_spill] sm:$0xff]  ;;  %v4268_v28 = vld [vmem:[#allocation26_spill] sm:$0xff] }
  0xf9   : > { %1964 = vst [vmem:[%s3258_s4 + $0x108] sm:$0xff] %v1894_v59  ;;  %1966 = vst.msk [vmem:[%s3258_s4 + $0x110] sm:$0xff] %vm1965_vm0, %v1895_v10  ;;  %v642_v35 = vmul.f32 %v4267_v57, %v4244_v46  ;;  %v643_v12 = vmul.f32 %v4268_v28, %v4244_v46  ;;  %v4269_v52 = vld [vmem:[#allocation27_spill] sm:$0xff]  ;;  %v4270_v7 = vld [vmem:[#allocation28_spill] sm:$0xff] }
  0xfa   : > { %v644_v47 = vmul.f32 %v4269_v52, %v4244_v46  ;;  %v645_v4 = vmul.f32 %v4270_v7, %v4244_v46  ;;  %v4271_v27 = vld [vmem:[#allocation29_spill] sm:$0xff]  ;;  %v4272_v39 = vld [vmem:[#allocation30_spill] sm:$0xff]  ;;  %v4273_v54 = vld [vmem:[#allocation31_spill] sm:$0xff] }
  0xfb   : > { %v646_v33 = vmul.f32 %v4271_v27, %v4244_v46  ;;  %v647_v32 = vmul.f32 %v4272_v39, %v4244_v46  ;;  %v648_v22 = vmul.f32 %v4273_v54, %v4244_v46  ;;  %v4274_v42 = vld [vmem:[#allocation32_spill] sm:$0xff]  ;;  %v4275_v51 = vld [vmem:[#allocation33_spill] sm:$0xff]  ;;  %v4276_v10 = vld [vmem:[#allocation34_spill] sm:$0xff] }
  0xfc   : > { %v649_v34 = vmul.f32 %v4274_v42, %v4244_v46  ;;  %v650_v59 = vmul.f32 %v4275_v51, %v4244_v46  ;;  %v651_v13 = vmul.f32 %v4276_v10, %v4244_v46  ;;  %v4277_v40 = vld [vmem:[#allocation35_spill] sm:$0xff]  ;;  %v4278_v25 = vld [vmem:[#allocation36_spill] sm:$0xff]  ;;  %v4279_v49 = vld [vmem:[#allocation37_spill] sm:$0xff] }
  0xfd   : > { %v652_v6 = vmul.f32 %v4277_v40, %v4244_v46  ;;  %v653_v61 = vmul.f32 %v4278_v25, %v4244_v46  ;;  %v654_v63 = vmul.f32 %v4279_v49, %v4244_v46  ;;  %v4280_v1 = vld [vmem:[#allocation125_spill] sm:$0xff]  ;;  %v4295_v28 = vld [vmem:[#allocation126_spill] sm:$0xff] }
  0xfe   : > { %v3364_v2 = vadd.f32 %v3243_v18, %v4280_v1  ;;  %v3368_v53 = vadd.f32 %v3247_v62, %v4280_v1  ;;  %v3372_v14 = vadd.f32 %v3251_v17, %v4280_v1  ;;  %v3376_v21 = vadd.f32 %v3262_v38, %v4280_v1 }
  0xff   : > { %v3379_v5 = vadd.f32 %v624_v24, %v4280_v1  ;;  %v3382_v46 = vadd.f32 %v625_v30, %v4280_v1  ;;  %v3385_v18 = vadd.f32 %v626_v26, %v4280_v1  ;;  %v3388_v62 = vadd.f32 %v627_v20, %v4280_v1 }
 0x100   : > { %v3391_v50 = vadd.f32 %v628_v16, %v4280_v1  ;;  %v3394_v17 = vadd.f32 %v629_v29, %v4280_v1  ;;  %v3397_v38 = vadd.f32 %v630_v0, %v4280_v1  ;;  %v3400_v24 = vadd.f32 %v631_v8, %v4280_v1 }
 0x101   : > { %v3403_v30 = vadd.f32 %v632_v37, %v4280_v1  ;;  %v3406_v26 = vadd.f32 %v633_v9, %v4280_v1  ;;  %v3409_v20 = vadd.f32 %v634_v3, %v4280_v1  ;;  %v3412_v16 = vadd.f32 %v635_v60, %v4280_v1 }
 0x102   : > { %v3415_v29 = vadd.f32 %v636_v19, %v4280_v1  ;;  %v3418_v0 = vadd.f32 %v637_v58, %v4280_v1  ;;  %v3421_v8 = vadd.f32 %v638_v55, %v4280_v1  ;;  %v3424_v37 = vadd.f32 %v639_v45, %v4280_v1 }
 0x103   : > { %v3427_v9 = vadd.f32 %v640_v11, %v4280_v1  ;;  %v3430_v3 = vadd.f32 %v641_v15, %v4280_v1  ;;  %v3433_v60 = vadd.f32 %v642_v35, %v4280_v1  ;;  %v3436_v19 = vadd.f32 %v643_v12, %v4280_v1  ;;  %v4296_v12 = vld [vmem:[#allocation38_spill] sm:$0xff] }
 0x104   : > { %v3439_v58 = vadd.f32 %v644_v47, %v4280_v1  ;;  %v3442_v31 = vadd.f32 %v645_v4, %v4280_v1  ;;  %v3445_v55 = vadd.f32 %v646_v33, %v4280_v1  ;;  %v3448_v44 = vadd.f32 %v647_v32, %v4280_v1  ;;  %v4297_v47 = vld [vmem:[#allocation39_spill] sm:$0xff]  ;;  %v4298_v4 = vld [vmem:[#allocation40_spill] sm:$0xff]  ;;  %v4299_v33 = vld [vmem:[#allocation41_spill] sm:$0xff] }
 0x105   : > { %4281 = vst [vmem:[#allocation108_spill] sm:$0xff] %v3430_v3  ;;  %4282 = vst [vmem:[#allocation109_spill] sm:$0xff] %v3433_v60  ;;  %v3451_v45 = vadd.f32 %v648_v22, %v4280_v1  ;;  %v3454_v23 = vadd.f32 %v649_v34, %v4280_v1  ;;  %v3457_v11 = vadd.f32 %v650_v59, %v4280_v1  ;;  %v4300_v32 = vld [vmem:[#allocation42_spill] sm:$0xff]  ;;  %v4301_v22 = vld [vmem:[#allocation43_spill] sm:$0xff] }
 0x106   : > { %4283 = vst [vmem:[#allocation110_spill] sm:$0xff] %v3436_v19  ;;  %4284 = vst [vmem:[#allocation111_spill] sm:$0xff] %v3439_v58  ;;  %v3460_v56 = vadd.f32 %v651_v13, %v4280_v1  ;;  %v3463_v15 = vadd.f32 %v652_v6, %v4280_v1  ;;  %v3466_v57 = vadd.f32 %v653_v61, %v4280_v1  ;;  %v4302_v34 = vld [vmem:[#allocation44_spill] sm:$0xff]  ;;  %v4303_v59 = vld [vmem:[#allocation45_spill] sm:$0xff] }
 0x107   : > { %4285 = vst [vmem:[#allocation112_spill] sm:$0xff] %v3442_v31  ;;  %4286 = vst [vmem:[#allocation113_spill] sm:$0xff] %v3445_v55  ;;  %v3469_v35 = vadd.f32 %v654_v63, %v4280_v1  ;;  %v1083_v52 = vmul.f32 %v4296_v12, %v4295_v28  ;;  %v1084_v7 = vmul.f32 %v4297_v47, %v4295_v28  ;;  %v4304_v13 = vld [vmem:[#allocation46_spill] sm:$0xff]  ;;  %v4305_v6 = vld [vmem:[#allocation47_spill] sm:$0xff] }
 0x108   : > { %4287 = vst [vmem:[#allocation114_spill] sm:$0xff] %v3448_v44  ;;  %4288 = vst [vmem:[#allocation115_spill] sm:$0xff] %v3451_v45  ;;  %v1085_v27 = vmul.f32 %v4298_v4, %v4295_v28  ;;  %v1086_v39 = vmul.f32 %v4299_v33, %v4295_v28  ;;  %v1087_v54 = vmul.f32 %v4300_v32, %v4295_v28  ;;  %v4306_v61 = vld [vmem:[#allocation48_spill] sm:$0xff]  ;;  %v4307_v63 = vld [vmem:[#allocation49_spill] sm:$0xff] }
 0x109   : > { %4289 = vst [vmem:[#allocation116_spill] sm:$0xff] %v3454_v23  ;;  %4290 = vst [vmem:[#allocation117_spill] sm:$0xff] %v3457_v11  ;;  %v1088_v42 = vmul.f32 %v4301_v22, %v4295_v28  ;;  %v1089_v51 = vmul.f32 %v4302_v34, %v4295_v28  ;;  %v1090_v10 = vmul.f32 %v4303_v59, %v4295_v28  ;;  %v4308_v12 = vld [vmem:[#allocation50_spill] sm:$0xff]  ;;  %v4309_v4 = vld [vmem:[#allocation51_spill] sm:$0xff] }
 0x10a   : > { %4291 = vst [vmem:[#allocation118_spill] sm:$0xff] %v3460_v56  ;;  %4292 = vst [vmem:[#allocation119_spill] sm:$0xff] %v3463_v15  ;;  %v1091_v40 = vmul.f32 %v4304_v13, %v4295_v28  ;;  %v1092_v25 = vmul.f32 %v4305_v6, %v4295_v28  ;;  %v1093_v49 = vmul.f32 %v4306_v61, %v4295_v28  ;;  %v4310_v32 = vld [vmem:[#allocation52_spill] sm:$0xff]  ;;  %v4311_v34 = vld [vmem:[#allocation53_spill] sm:$0xff] }
 0x10b   : > { %4293 = vst [vmem:[#allocation120_spill] sm:$0xff] %v3466_v57  ;;  %4294 = vst [vmem:[#allocation121_spill] sm:$0xff] %v3469_v35  ;;  %v1094_v1 = vmul.f32 %v4307_v63, %v4295_v28  ;;  %v1095_v47 = vmul.f32 %v4308_v12, %v4295_v28  ;;  %v1096_v33 = vmul.f32 %v4309_v4, %v4295_v28  ;;  %v4312_v13 = vld [vmem:[#allocation54_spill] sm:$0xff]  ;;  %v4313_v61 = vld [vmem:[#allocation55_spill] sm:$0xff] }
 0x10c   : > { %v1097_v22 = vmul.f32 %v4310_v32, %v4295_v28  ;;  %v1098_v59 = vmul.f32 %v4311_v34, %v4295_v28  ;;  %v1099_v6 = vmul.f32 %v4312_v13, %v4295_v28  ;;  %v1100_v41 = vmul.f32 %v4313_v61, %v4295_v28  ;;  %v4314_v63 = vld [vmem:[#allocation56_spill] sm:$0xff]  ;;  %v4315_v12 = vld [vmem:[#allocation57_spill] sm:$0xff]  ;;  %v4316_v4 = vld [vmem:[#allocation58_spill] sm:$0xff] }
 0x10d   : > { %v1101_v48 = vmul.f32 %v4314_v63, %v4295_v28  ;;  %v1102_v43 = vmul.f32 %v4315_v12, %v4295_v28  ;;  %v1103_v36 = vmul.f32 %v4316_v4, %v4295_v28  ;;  %v4317_v32 = vld [vmem:[#allocation59_spill] sm:$0xff]  ;;  %v4318_v34 = vld [vmem:[#allocation60_spill] sm:$0xff]  ;;  %v4319_v13 = vld [vmem:[#allocation61_spill] sm:$0xff] }
 0x10e   : > { %v1104_v35 = vmul.f32 %v4317_v32, %v4295_v28  ;;  %v1105_v57 = vmul.f32 %v4318_v34, %v4295_v28  ;;  %v1106_v15 = vmul.f32 %v4319_v13, %v4295_v28  ;;  %v4320_v61 = vld [vmem:[#allocation62_spill] sm:$0xff]  ;;  %v4321_v63 = vld [vmem:[#allocation63_spill] sm:$0xff]  ;;  %v4322_v12 = vld [vmem:[#allocation64_spill] sm:$0xff] }
 0x10f   : > { %v1107_v56 = vmul.f32 %v4320_v61, %v4295_v28  ;;  %v1108_v11 = vmul.f32 %v4321_v63, %v4295_v28  ;;  %v1109_v23 = vmul.f32 %v4322_v12, %v4295_v28  ;;  %v4323_v4 = vld [vmem:[#allocation65_spill] sm:$0xff]  ;;  %v4324_v32 = vld [vmem:[#allocation66_spill] sm:$0xff]  ;;  %v4325_v34 = vld [vmem:[#allocation67_spill] sm:$0xff] }
 0x110   : > { %v1110_v45 = vmul.f32 %v4323_v4, %v4295_v28  ;;  %v1111_v44 = vmul.f32 %v4324_v32, %v4295_v28  ;;  %v1112_v55 = vmul.f32 %v4325_v34, %v4295_v28  ;;  %v4326_v13 = vld [vmem:[#allocation68_spill] sm:$0xff]  ;;  %v4327_v61 = vld [vmem:[#allocation69_spill] sm:$0xff]  ;;  %v4328_v63 = vld [vmem:[#allocation70_spill] sm:$0xff]  ;;  %v3542_v32 = vadd.f32 %v1083_v52, %v3364_v2 }
 0x111   : > { %v1113_v31 = vmul.f32 %v4326_v13, %v4295_v28  ;;  %v1114_v58 = vmul.f32 %v4327_v61, %v4295_v28  ;;  %v1115_v19 = vmul.f32 %v4328_v63, %v4295_v28  ;;  %v4329_v12 = vld [vmem:[#allocation71_spill] sm:$0xff]  ;;  %v4330_v4 = vld [vmem:[#allocation72_spill] sm:$0xff]  ;;  %v3545_v34 = vadd.f32 %v1084_v7, %v3368_v53  ;;  %v4336_v7 = vld [vmem:[#allocation109_spill] sm:$0xff] }
 0x112   : > { %v1116_v60 = vmul.f32 %v4329_v12, %v4295_v28  ;;  %v1117_v3 = vmul.f32 %v4330_v4, %v4295_v28  ;;  %v3548_v13 = vadd.f32 %v1085_v27, %v3372_v14  ;;  %v3551_v61 = vadd.f32 %v1086_v39, %v3376_v21  ;;  %v4367_v4 = vld [vmem:[#allocation77_spill] sm:$0xff] }
 0x113   : > { %v3554_v63 = vadd.f32 %v1087_v54, %v3379_v5  ;;  %v3557_v12 = vadd.f32 %v1088_v42, %v3382_v46  ;;  %v3560_v28 = vadd.f32 %v1089_v51, %v3385_v18  ;;  %v3563_v2 = vadd.f32 %v1090_v10, %v3388_v62 }
 0x114   : > { %v3566_v53 = vadd.f32 %v1091_v40, %v3391_v50  ;;  %v3569_v14 = vadd.f32 %v1092_v25, %v3394_v17  ;;  %v3572_v21 = vadd.f32 %v1093_v49, %v3397_v38  ;;  %v3575_v5 = vadd.f32 %v1094_v1, %v3400_v24 }
 0x115   : > { %v3578_v46 = vadd.f32 %v1095_v47, %v3403_v30  ;;  %v3581_v18 = vadd.f32 %v1096_v33, %v3406_v26  ;;  %v3584_v62 = vadd.f32 %v1097_v22, %v3409_v20  ;;  %v3587_v50 = vadd.f32 %v1098_v59, %v3412_v16  ;;  %v4334_v20 = vld [vmem:[#allocation108_spill] sm:$0xff]  ;;  %v1194_v16 = vpop.permute.xlu0 %1193  ;;  %v4363_v47 = vld [vmem:[#allocation73_spill] sm:$0xff]  ;;  %v4364_v33 = vld [vmem:[#allocation74_spill] sm:$0xff] }
 0x116   : > { %v3590_v17 = vadd.f32 %v1099_v6, %v3415_v29  ;;  %v3593_v38 = vadd.f32 %v1100_v41, %v3418_v0  ;;  %v3596_v24 = vadd.f32 %v1101_v48, %v3421_v8  ;;  %v3599_v30 = vadd.f32 %v1102_v43, %v3424_v37  ;;  %v4338_v29 = vld [vmem:[#allocation110_spill] sm:$0xff]  ;;  %v4340_v41 = vld [vmem:[#allocation111_spill] sm:$0xff]  ;;  %v4342_v48 = vld [vmem:[#allocation112_spill] sm:$0xff] }
 0x117   : > { %v3602_v26 = vadd.f32 %v1103_v36, %v3427_v9  ;;  %v3605_v52 = vadd.f32 %v1104_v35, %v4334_v20  ;;  %v3608_v27 = vadd.f32 %v1105_v57, %v4336_v7  ;;  %v3611_v39 = vadd.f32 %v1106_v15, %v4338_v29  ;;  %v4344_v43 = vld [vmem:[#allocation113_spill] sm:$0xff]  ;;  %v4346_v36 = vld [vmem:[#allocation114_spill] sm:$0xff]  ;;  %v4348_v35 = vld [vmem:[#allocation115_spill] sm:$0xff] }
 0x118   : > { %4331 = vst [vmem:[#allocation122_spill] sm:$0xff] %v3596_v24  ;;  %4332 = vst [vmem:[#allocation123_spill] sm:$0xff] %v3599_v30  ;;  %v3614_v0 = vadd.f32 %v1107_v56, %v4340_v41  ;;  %v3617_v8 = vadd.f32 %v1108_v11, %v4342_v48  ;;  %v3620_v37 = vadd.f32 %v1109_v23, %v4344_v43  ;;  %v4350_v57 = vld [vmem:[#allocation116_spill] sm:$0xff]  ;;  %v4352_v15 = vld [vmem:[#allocation117_spill] sm:$0xff] }
 0x119   : > { %4333 = vst [vmem:[#allocation124_spill] sm:$0xff] %v3602_v26  ;;  %4335 = vst [vmem:[#allocation107_spill] sm:$0xff] %v3605_v52  ;;  %v3623_v9 = vadd.f32 %v1110_v45, %v4346_v36  ;;  %v3626_v54 = vadd.f32 %v1111_v44, %v4348_v35  ;;  %v3629_v42 = vadd.f32 %v1112_v55, %v4350_v57  ;;  %v4354_v56 = vld [vmem:[#allocation118_spill] sm:$0xff]  ;;  %v4356_v11 = vld [vmem:[#allocation119_spill] sm:$0xff] }
 0x11a   : > { %4337 = vst [vmem:[#allocation3_spill] sm:$0xff] %v3608_v27  ;;  %4339 = vst [vmem:[#allocation4_spill] sm:$0xff] %v3611_v39  ;;  %v3632_v51 = vadd.f32 %v1113_v31, %v4352_v15  ;;  %v3635_v10 = vadd.f32 %v1114_v58, %v4354_v56  ;;  %v3638_v40 = vadd.f32 %v1115_v19, %v4356_v11  ;;  %v4358_v23 = vld [vmem:[#allocation120_spill] sm:$0xff]  ;;  %v4360_v45 = vld [vmem:[#allocation121_spill] sm:$0xff] }
 0x11b   : > { %4341 = vst [vmem:[#allocation5_spill] sm:$0xff] %v3614_v0  ;;  %4343 = vst [vmem:[#allocation6_spill] sm:$0xff] %v3617_v8  ;;  %v3641_v25 = vadd.f32 %v1116_v60, %v4358_v23  ;;  %v3644_v49 = vadd.f32 %v1117_v3, %v4360_v45  ;;  %v4362_v44 = vld [vmem:[#allocation2_spill] sm:$0xff]  ;;  %v1547_v55 = vmul.f32 %v4363_v47, %v1194_v16  ;;  %v4365_v31 = vld [vmem:[#allocation75_spill] sm:$0xff] }
 0x11c   : > { %4345 = vst [vmem:[#allocation7_spill] sm:$0xff] %v3620_v37  ;;  %4347 = vst [vmem:[#allocation8_spill] sm:$0xff] %v3623_v9  ;;  %v1546_v1 = vmul.f32 %v4362_v44, %v1194_v16  ;;  %v1548_v22 = vmul.f32 %v4364_v33, %v1194_v16  ;;  %v1549_v59 = vmul.f32 %v4365_v31, %v1194_v16  ;;  %v4366_v6 = vld [vmem:[#allocation76_spill] sm:$0xff]  ;;  %v4368_v19 = vld [vmem:[#allocation78_spill] sm:$0xff] }
 0x11d   : > { %4349 = vst [vmem:[#allocation9_spill] sm:$0xff] %v3626_v54  ;;  %4351 = vst [vmem:[#allocation10_spill] sm:$0xff] %v3629_v42  ;;  %v1550_v58 = vmul.f32 %v4366_v6, %v1194_v16  ;;  %v1551_v20 = vmul.f32 %v4367_v4, %v1194_v16  ;;  %v1552_v7 = vmul.f32 %v4368_v19, %v1194_v16  ;;  %v4369_v29 = vld [vmem:[#allocation79_spill] sm:$0xff]  ;;  %v4370_v41 = vld [vmem:[#allocation80_spill] sm:$0xff] }
 0x11e   : > { %4353 = vst [vmem:[#allocation11_spill] sm:$0xff] %v3632_v51  ;;  %4355 = vst [vmem:[#allocation12_spill] sm:$0xff] %v3635_v10  ;;  %v1553_v60 = vmul.f32 %v4369_v29, %v1194_v16  ;;  %v1554_v48 = vmul.f32 %v4370_v41, %v1194_v16  ;;  %v4371_v3 = vld [vmem:[#allocation81_spill] sm:$0xff]  ;;  %v4372_v36 = vld [vmem:[#allocation82_spill] sm:$0xff] }
 0x11f   : > { %4357 = vst [vmem:[#allocation13_spill] sm:$0xff] %v3638_v40  ;;  %4359 = vst [vmem:[#allocation14_spill] sm:$0xff] %v3641_v25  ;;  %v1555_v43 = vmul.f32 %v4371_v3, %v1194_v16  ;;  %v1556_v35 = vmul.f32 %v4372_v36, %v1194_v16  ;;  %v4373_v57 = vld [vmem:[#allocation83_spill] sm:$0xff]  ;;  %v4374_v56 = vld [vmem:[#allocation84_spill] sm:$0xff] }
 0x120   : > { %4361 = vst [vmem:[#allocation15_spill] sm:$0xff] %v3644_v49  ;;  %v1557_v15 = vmul.f32 %v4373_v57, %v1194_v16  ;;  %v1558_v11 = vmul.f32 %v4374_v56, %v1194_v16  ;;  %v4375_v23 = vld [vmem:[#allocation85_spill] sm:$0xff]  ;;  %v4376_v44 = vld [vmem:[#allocation86_spill] sm:$0xff]  ;;  %v4377_v33 = vld [vmem:[#allocation87_spill] sm:$0xff] }
 0x121   : > { %v1559_v45 = vmul.f32 %v4375_v23, %v1194_v16  ;;  %v1560_v47 = vmul.f32 %v4376_v44, %v1194_v16  ;;  %v1561_v31 = vmul.f32 %v4377_v33, %v1194_v16  ;;  %v4378_v6 = vld [vmem:[#allocation88_spill] sm:$0xff]  ;;  %v4379_v19 = vld [vmem:[#allocation89_spill] sm:$0xff]  ;;  %v4380_v49 = vld [vmem:[#allocation90_spill] sm:$0xff] }
 0x122   : > { %v1562_v4 = vmul.f32 %v4378_v6, %v1194_v16  ;;  %v1563_v29 = vmul.f32 %v4379_v19, %v1194_v16  ;;  %v1564_v41 = vmul.f32 %v4380_v49, %v1194_v16  ;;  %v4381_v25 = vld [vmem:[#allocation91_spill] sm:$0xff]  ;;  %v4382_v40 = vld [vmem:[#allocation92_spill] sm:$0xff]  ;;  %v4383_v10 = vld [vmem:[#allocation93_spill] sm:$0xff] }
 0x123   : > { %v1565_v3 = vmul.f32 %v4381_v25, %v1194_v16  ;;  %v1566_v36 = vmul.f32 %v4382_v40, %v1194_v16  ;;  %v1567_v57 = vmul.f32 %v4383_v10, %v1194_v16  ;;  %v4384_v51 = vld [vmem:[#allocation94_spill] sm:$0xff]  ;;  %v4385_v42 = vld [vmem:[#allocation95_spill] sm:$0xff]  ;;  %v4386_v54 = vld [vmem:[#allocation96_spill] sm:$0xff] }
 0x124   : > { %v1568_v56 = vmul.f32 %v4384_v51, %v1194_v16  ;;  %v1569_v23 = vmul.f32 %v4385_v42, %v1194_v16  ;;  %v1570_v44 = vmul.f32 %v4386_v54, %v1194_v16  ;;  %v4387_v9 = vld [vmem:[#allocation97_spill] sm:$0xff]  ;;  %v4388_v37 = vld [vmem:[#allocation98_spill] sm:$0xff]  ;;  %v4389_v8 = vld [vmem:[#allocation99_spill] sm:$0xff] }
 0x125   : > { %v1571_v33 = vmul.f32 %v4387_v9, %v1194_v16  ;;  %v1572_v6 = vmul.f32 %v4388_v37, %v1194_v16  ;;  %v1573_v19 = vmul.f32 %v4389_v8, %v1194_v16  ;;  %v4390_v0 = vld [vmem:[#allocation100_spill] sm:$0xff]  ;;  %v4391_v39 = vld [vmem:[#allocation101_spill] sm:$0xff]  ;;  %v4392_v27 = vld [vmem:[#allocation102_spill] sm:$0xff]  ;;  %v3682_v9 = vadd.f32 %v1546_v1, %v3542_v32 }
 0x126   : > { %v1574_v49 = vmul.f32 %v4390_v0, %v1194_v16  ;;  %v1575_v25 = vmul.f32 %v4391_v39, %v1194_v16  ;;  %v1576_v40 = vmul.f32 %v4392_v27, %v1194_v16  ;;  %v4393_v52 = vld [vmem:[#allocation103_spill] sm:$0xff]  ;;  %v4394_v26 = vld [vmem:[#allocation104_spill] sm:$0xff]  ;;  %v4395_v30 = vld [vmem:[#allocation105_spill] sm:$0xff]  ;;  %v3685_v37 = vadd.f32 %v1547_v55, %v3545_v34 }
 0x127   : > { %v1577_v10 = vmul.f32 %v4393_v52, %v1194_v16  ;;  %v1578_v51 = vmul.f32 %v4394_v26, %v1194_v16  ;;  %v1579_v42 = vmul.f32 %v4395_v30, %v1194_v16  ;;  %v4396_v24 = vld [vmem:[#allocation106_spill] sm:$0xff]  ;;  %v3688_v0 = vadd.f32 %v1548_v22, %v3548_v13 }
 0x128   : > { %v1580_v54 = vmul.f32 %v4396_v24, %v1194_v16  ;;  %v3691_v39 = vadd.f32 %v1549_v59, %v3551_v61  ;;  %v3694_v52 = vadd.f32 %v1550_v58, %v3554_v63  ;;  %v3697_v26 = vadd.f32 %v1551_v20, %v3557_v12  ;;  %v4404_v59 = vld [vmem:[#allocation6_spill] sm:$0xff]  ;;  %v4405_v20 = vld [vmem:[#allocation7_spill] sm:$0xff] }
 0x129   : > { %v3700_v24 = vadd.f32 %v1552_v7, %v3560_v28  ;;  %v3703_v32 = vadd.f32 %v1553_v60, %v3563_v2  ;;  %v3706_v34 = vadd.f32 %v1554_v48, %v3566_v53  ;;  %v3709_v13 = vadd.f32 %v1555_v43, %v3569_v14  ;;  %v4406_v60 = vld [vmem:[#allocation8_spill] sm:$0xff]  ;;  %v4407_v43 = vld [vmem:[#allocation9_spill] sm:$0xff] }
 0x12a   : > { %v3712_v61 = vadd.f32 %v1556_v35, %v3572_v21  ;;  %v3715_v63 = vadd.f32 %v1557_v15, %v3575_v5  ;;  %v3718_v12 = vadd.f32 %v1558_v11, %v3578_v46  ;;  %v3721_v28 = vadd.f32 %v1559_v45, %v3581_v18  ;;  %v4397_v5 = vld [vmem:[#allocation122_spill] sm:$0xff]  ;;  %v4398_v46 = vld [vmem:[#allocation123_spill] sm:$0xff]  ;;  %v4399_v18 = vld [vmem:[#allocation124_spill] sm:$0xff] }
 0x12b   : > { %v3724_v2 = vadd.f32 %v1560_v47, %v3584_v62  ;;  %v3727_v53 = vadd.f32 %v1561_v31, %v3587_v50  ;;  %v3730_v14 = vadd.f32 %v1562_v4, %v3590_v17  ;;  %v3733_v21 = vadd.f32 %v1563_v29, %v3593_v38  ;;  %v4400_v62 = vld [vmem:[#allocation107_spill] sm:$0xff]  ;;  %v4402_v17 = vld [vmem:[#allocation4_spill] sm:$0xff]  ;;  %v4403_v38 = vld [vmem:[#allocation5_spill] sm:$0xff] }
 0x12c   : > { %v3736_v30 = vadd.f32 %v1564_v41, %v4397_v5  ;;  %v3739_v16 = vadd.f32 %v1565_v3, %v4398_v46  ;;  %v3742_v27 = vadd.f32 %v1566_v36, %v4399_v18  ;;  %v3745_v8 = vadd.f32 %v1567_v57, %v4400_v62  ;;  %v4401_v50 = vld [vmem:[#allocation3_spill] sm:$0xff]  ;;  %v4408_v15 = vld [vmem:[#allocation10_spill] sm:$0xff]  ;;  %v4410_v31 = vld [vmem:[#allocation12_spill] sm:$0xff] }
 0x12d   : > { %v3748_v1 = vadd.f32 %v1568_v56, %v4401_v50  ;;  %v3751_v55 = vadd.f32 %v1569_v23, %v4402_v17  ;;  %v3754_v22 = vadd.f32 %v1570_v44, %v4403_v38  ;;  %v3757_v58 = vadd.f32 %v1571_v33, %v4404_v59  ;;  %v4409_v45 = vld [vmem:[#allocation11_spill] sm:$0xff]  ;;  %v4411_v29 = vld [vmem:[#allocation13_spill] sm:$0xff]  ;;  %v4412_v3 = vld [vmem:[#allocation14_spill] sm:$0xff] }
 0x12e   : > { %v3760_v7 = vadd.f32 %v1572_v6, %v4405_v20  ;;  %v3763_v48 = vadd.f32 %v1573_v19, %v4406_v60  ;;  %v3766_v35 = vadd.f32 %v1574_v49, %v4407_v43  ;;  %v3769_v11 = vadd.f32 %v1575_v25, %v4408_v15  ;;  %v4413_v57 = vld [vmem:[#allocation15_spill] sm:$0xff] }
 0x12f   : > { %v3772_v47 = vadd.f32 %v1576_v40, %v4409_v45  ;;  %v3775_v4 = vadd.f32 %v1577_v10, %v4410_v31  ;;  %v3778_v41 = vadd.f32 %v1578_v51, %v4411_v29  ;;  %v3781_v36 = vadd.f32 %v1579_v42, %v4412_v3 }
 0x130   : > { %v3784_v56 = vadd.f32 %v1580_v54, %v4413_v57  ;;  %v1686_v23 = vmin.f32 %v3682_v9, 6.0  ;;  %v1687_v44 = vmin.f32 %v3685_v37, 6.0  ;;  %v1688_v33 = vmin.f32 %v3688_v0, 6.0 }
 0x131   : > { %v1689_v6 = vmin.f32 %v3691_v39, 6.0  ;;  %v1690_v19 = vmin.f32 %v3694_v52, 6.0  ;;  %v1691_v49 = vmin.f32 %v3697_v26, 6.0  ;;  %v1692_v25 = vmin.f32 %v3700_v24, 6.0 }
 0x132   : > { %v1693_v40 = vmin.f32 %v3703_v32, 6.0  ;;  %v1694_v10 = vmin.f32 %v3706_v34, 6.0  ;;  %v1695_v51 = vmin.f32 %v3709_v13, 6.0  ;;  %v1696_v42 = vmin.f32 %v3712_v61, 6.0 }
 0x133   : > { %v1697_v54 = vmin.f32 %v3715_v63, 6.0  ;;  %v1698_v9 = vmin.f32 %v3718_v12, 6.0  ;;  %v1699_v37 = vmin.f32 %v3721_v28, 6.0  ;;  %v1700_v0 = vmin.f32 %v3724_v2, 6.0 }
 0x134   : > { %v1701_v39 = vmin.f32 %v3727_v53, 6.0  ;;  %v1702_v52 = vmin.f32 %v3730_v14, 6.0  ;;  %v1703_v26 = vmin.f32 %v3733_v21, 6.0  ;;  %v1704_v24 = vmin.f32 %v3736_v30, 6.0 }
 0x135   : > { %v1705_v32 = vmin.f32 %v3739_v16, 6.0  ;;  %v1706_v34 = vmin.f32 %v3742_v27, 6.0  ;;  %v1707_v13 = vmin.f32 %v3745_v8, 6.0  ;;  %v1708_v61 = vmin.f32 %v3748_v1, 6.0 }
 0x136   : > { %v1709_v63 = vmin.f32 %v3751_v55, 6.0  ;;  %v1710_v12 = vmin.f32 %v3754_v22, 6.0  ;;  %v1711_v28 = vmin.f32 %v3757_v58, 6.0  ;;  %v1712_v2 = vmin.f32 %v3760_v7, 6.0 }
 0x137   : > { %v1713_v53 = vmin.f32 %v3763_v48, 6.0  ;;  %v1714_v14 = vmin.f32 %v3766_v35, 6.0  ;;  %v1715_v21 = vmin.f32 %v3769_v11, 6.0  ;;  %v1716_v5 = vmin.f32 %v3772_v47, 6.0 }
 0x138   : > { %v1717_v30 = vmin.f32 %v3775_v4, 6.0  ;;  %v1718_v46 = vmin.f32 %v3778_v41, 6.0  ;;  %v1719_v16 = vmin.f32 %v3781_v36, 6.0  ;;  %v1720_v18 = vmin.f32 %v3784_v56, 6.0 }
 0x139   : > { %v1756_v27 = vmul.f32 %v1686_v23, %v1686_v23  ;;  %v1757_v62 = vmul.f32 %v1687_v44, %v1687_v44  ;;  %v1758_v8 = vmul.f32 %v1688_v33, %v1688_v33  ;;  %v1759_v50 = vmul.f32 %v1689_v6, %v1689_v6 }
 0x13a   : > { %v1760_v1 = vmul.f32 %v1690_v19, %v1690_v19  ;;  %v1761_v17 = vmul.f32 %v1691_v49, %v1691_v49  ;;  %v1762_v55 = vmul.f32 %v1692_v25, %v1692_v25  ;;  %v1763_v38 = vmul.f32 %v1693_v40, %v1693_v40 }
 0x13b   : > { %v1764_v22 = vmul.f32 %v1694_v10, %v1694_v10  ;;  %v1765_v59 = vmul.f32 %v1695_v51, %v1695_v51  ;;  %v1766_v58 = vmul.f32 %v1696_v42, %v1696_v42  ;;  %v1767_v20 = vmul.f32 %v1697_v54, %v1697_v54 }
 0x13c   : > { %v1768_v7 = vmul.f32 %v1698_v9, %v1698_v9  ;;  %v1769_v60 = vmul.f32 %v1699_v37, %v1699_v37  ;;  %v1770_v48 = vmul.f32 %v1700_v0, %v1700_v0  ;;  %v1771_v43 = vmul.f32 %v1701_v39, %v1701_v39 }
 0x13d   : > { %v1772_v35 = vmul.f32 %v1702_v52, %v1702_v52  ;;  %v1773_v15 = vmul.f32 %v1703_v26, %v1703_v26  ;;  %v1774_v11 = vmul.f32 %v1704_v24, %v1704_v24  ;;  %v1775_v45 = vmul.f32 %v1705_v32, %v1705_v32 }
 0x13e   : > { %v1776_v47 = vmul.f32 %v1706_v34, %v1706_v34  ;;  %v1777_v31 = vmul.f32 %v1707_v13, %v1707_v13  ;;  %v1778_v4 = vmul.f32 %v1708_v61, %v1708_v61  ;;  %v1779_v29 = vmul.f32 %v1709_v63, %v1709_v63 }
 0x13f   : > { %v1780_v41 = vmul.f32 %v1710_v12, %v1710_v12  ;;  %v1781_v3 = vmul.f32 %v1711_v28, %v1711_v28  ;;  %v1782_v36 = vmul.f32 %v1712_v2, %v1712_v2  ;;  %v1783_v57 = vmul.f32 %v1713_v53, %v1713_v53 }
 0x140   : > { %v1826_v56 = vmul.f32 0.16666667, %v1756_v27  ;;  %v1827_v23 = vmul.f32 0.16666667, %v1757_v62  ;;  %v1784_v44 = vmul.f32 %v1714_v14, %v1714_v14  ;;  %v1828_v33 = vmul.f32 0.16666667, %v1758_v8 }
 0x141   : > { %v1829_v6 = vmul.f32 0.16666667, %v1759_v50  ;;  %v1830_v19 = vmul.f32 0.16666667, %v1760_v1  ;;  %v1785_v49 = vmul.f32 %v1715_v21, %v1715_v21  ;;  %v1831_v25 = vmul.f32 0.16666667, %v1761_v17 }
 0x142   : > { %v1832_v40 = vmul.f32 0.16666667, %v1762_v55  ;;  %v1833_v10 = vmul.f32 0.16666667, %v1763_v38  ;;  %v1786_v51 = vmul.f32 %v1716_v5, %v1716_v5  ;;  %v1834_v42 = vmul.f32 0.16666667, %v1764_v22 }
 0x143   : > { %v1835_v54 = vmul.f32 0.16666667, %v1765_v59  ;;  %v1836_v9 = vmul.f32 0.16666667, %v1766_v58  ;;  %v1787_v37 = vmul.f32 %v1717_v30, %v1717_v30  ;;  %v1837_v0 = vmul.f32 0.16666667, %v1767_v20 }
 0x144   : > { %v1838_v39 = vmul.f32 0.16666667, %v1768_v7  ;;  %v1839_v52 = vmul.f32 0.16666667, %v1769_v60  ;;  %v1788_v26 = vmul.f32 %v1718_v46, %v1718_v46  ;;  %v1840_v24 = vmul.f32 0.16666667, %v1770_v48 }
 0x145   : > { %v1841_v32 = vmul.f32 0.16666667, %v1771_v43  ;;  %v1842_v34 = vmul.f32 0.16666667, %v1772_v35  ;;  %v1789_v13 = vmul.f32 %v1719_v16, %v1719_v16  ;;  %v1843_v61 = vmul.f32 0.16666667, %v1773_v15 }
 0x146   : > { %v1844_v63 = vmul.f32 0.16666667, %v1774_v11  ;;  %v1845_v12 = vmul.f32 0.16666667, %v1775_v45  ;;  %v1790_v28 = vmul.f32 %v1720_v18, %v1720_v18  ;;  %v1846_v2 = vmul.f32 0.16666667, %v1776_v47 }
 0x147   : > { %v1847_v53 = vmul.f32 0.16666667, %v1777_v31  ;;  %v1848_v14 = vmul.f32 0.16666667, %v1778_v4  ;;  %v1849_v21 = vmul.f32 0.16666667, %v1779_v29 }
 0x148   : > { %v1850_v5 = vmul.f32 0.16666667, %v1780_v41  ;;  %v1851_v27 = vmul.f32 0.16666667, %v1781_v3  ;;  %v1852_v62 = vmul.f32 0.16666667, %v1782_v36 }
 0x149   : > { %v1853_v30 = vmul.f32 0.16666667, %v1783_v57  ;;  %v1854_v8 = vmul.f32 0.16666667, %v1784_v44  ;;  %v1855_v50 = vmul.f32 0.16666667, %v1785_v49 }
 0x14a   : > { %v1856_v1 = vmul.f32 0.16666667, %v1786_v51  ;;  %v1857_v46 = vmul.f32 0.16666667, %v1787_v37  ;;  %v1858_v17 = vmul.f32 0.16666667, %v1788_v26 }
 0x14b   : > { %v1859_v16 = vmul.f32 0.16666667, %v1789_v13  ;;  %v1860_v55 = vmul.f32 0.16666667, %v1790_v28  ;;  %v1896_v18 = vadd.f32 6.0, %v1826_v56  ;;  %v1897_v38 = vadd.f32 6.0, %v1827_v23 }
 0x14c   : > { %v1898_v22 = vadd.f32 6.0, %v1828_v33  ;;  %v1899_v59 = vadd.f32 6.0, %v1829_v6  ;;  %v1900_v58 = vadd.f32 6.0, %v1830_v19  ;;  %v1901_v20 = vadd.f32 6.0, %v1831_v25 }
 0x14d   : > { %v1902_v7 = vadd.f32 6.0, %v1832_v40  ;;  %v1903_v60 = vadd.f32 6.0, %v1833_v10  ;;  %v1904_v48 = vadd.f32 6.0, %v1834_v42  ;;  %v1905_v43 = vadd.f32 6.0, %v1835_v54  ;;  %1967 = vst [vmem:[%s3258_s4 + $0x118] sm:$0x1f] %v1896_v18 }
 0x14e   : > { %v1906_v35 = vadd.f32 6.0, %v1836_v9  ;;  %v1907_v15 = vadd.f32 6.0, %v1837_v0  ;;  %1968 = vst [vmem:[%s3258_s4 + $0x120] sm:$0x1f] %v1897_v38  ;;  %1969 = vst [vmem:[%s3258_s4 + $0x128] sm:$0x1f] %v1898_v22 }
 0x14f   : > { %1970 = vst [vmem:[%s3258_s4 + $0x130] sm:$0x1f] %v1899_v59  ;;  %v1908_v11 = vadd.f32 6.0, %v1838_v39  ;;  %v1909_v45 = vadd.f32 6.0, %v1839_v52  ;;  %v1910_v47 = vadd.f32 6.0, %v1840_v24  ;;  %v1911_v31 = vadd.f32 6.0, %v1841_v32 }
 0x150   : > { %1971 = vst [vmem:[%s3258_s4 + $0x138] sm:$0x1f] %v1900_v58  ;;  %1972 = vst [vmem:[%s3258_s4 + $0x140] sm:$0x1f] %v1901_v20  ;;  %v1912_v4 = vadd.f32 6.0, %v1842_v34  ;;  %v1913_v29 = vadd.f32 6.0, %v1843_v61 }
 0x151   : > { %1973 = vst [vmem:[%s3258_s4 + $0x148] sm:$0x1f] %v1902_v7  ;;  %1974 = vst [vmem:[%s3258_s4 + $0x150] sm:$0x1f] %v1903_v60  ;;  %v1914_v41 = vadd.f32 6.0, %v1844_v63  ;;  %v1915_v3 = vadd.f32 6.0, %v1845_v12 }
 0x152   : > { %1975 = vst [vmem:[%s3258_s4 + $0x158] sm:$0x1f] %v1904_v48  ;;  %1976 = vst [vmem:[%s3258_s4 + $0x160] sm:$0x1f] %v1905_v43  ;;  %v1916_v36 = vadd.f32 6.0, %v1846_v2  ;;  %v1917_v57 = vadd.f32 6.0, %v1847_v53 }
 0x153   : > { %1977 = vst [vmem:[%s3258_s4 + $0x168] sm:$0x1f] %v1906_v35  ;;  %1978 = vst [vmem:[%s3258_s4 + $0x170] sm:$0x1f] %v1907_v15  ;;  %v1918_v56 = vadd.f32 6.0, %v1848_v14  ;;  %v1919_v23 = vadd.f32 6.0, %v1849_v21 }
 0x154   : > { %1979 = vst [vmem:[%s3258_s4 + $0x178] sm:$0x1f] %v1908_v11  ;;  %1980 = vst [vmem:[%s3258_s4 + $0x180] sm:$0x1f] %v1909_v45  ;;  %v1920_v44 = vadd.f32 6.0, %v1850_v5  ;;  %v1921_v33 = vadd.f32 6.0, %v1851_v27 }
 0x155   : > { %1981 = vst [vmem:[%s3258_s4 + $0x188] sm:$0x1f] %v1910_v47  ;;  %1982 = vst [vmem:[%s3258_s4 + $0x190] sm:$0x1f] %v1911_v31  ;;  %v1922_v6 = vadd.f32 6.0, %v1852_v62  ;;  %v1923_v19 = vadd.f32 6.0, %v1853_v30 }
 0x156   : > { %1983 = vst [vmem:[%s3258_s4 + $0x198] sm:$0x1f] %v1912_v4  ;;  %1984 = vst [vmem:[%s3258_s4 + $0x1a0] sm:$0x1f] %v1913_v29  ;;  %v1924_v49 = vadd.f32 6.0, %v1854_v8  ;;  %v1925_v25 = vadd.f32 6.0, %v1855_v50 }
 0x157   : > { %1985 = vst [vmem:[%s3258_s4 + $0x1a8] sm:$0x1f] %v1914_v41  ;;  %1986 = vst [vmem:[%s3258_s4 + $0x1b0] sm:$0x1f] %v1915_v3  ;;  %v1926_v40 = vadd.f32 6.0, %v1856_v1  ;;  %v1927_v10 = vadd.f32 6.0, %v1857_v46 }
 0x158   : > { %1987 = vst [vmem:[%s3258_s4 + $0x1b8] sm:$0x1f] %v1916_v36  ;;  %1988 = vst [vmem:[%s3258_s4 + $0x1c0] sm:$0x1f] %v1917_v57  ;;  %v1928_v51 = vadd.f32 6.0, %v1858_v17  ;;  %v1929_v42 = vadd.f32 6.0, %v1859_v16 }
 0x159   : > { %1989 = vst [vmem:[%s3258_s4 + $0x1c8] sm:$0x1f] %v1918_v56  ;;  %1990 = vst [vmem:[%s3258_s4 + $0x1d0] sm:$0x1f] %v1919_v23  ;;  %v1930_v54 = vadd.f32 6.0, %v1860_v55 }
 0x15a   : > { %1991 = vst [vmem:[%s3258_s4 + $0x1d8] sm:$0x1f] %v1920_v44  ;;  %1992 = vst [vmem:[%s3258_s4 + $0x1e0] sm:$0x1f] %v1921_v33 }
 0x15b   : > { %1993 = vst [vmem:[%s3258_s4 + $0x1e8] sm:$0x1f] %v1922_v6  ;;  %1994 = vst [vmem:[%s3258_s4 + $0x1f0] sm:$0x1f] %v1923_v19 }
 0x15c   : > { %1995 = vst [vmem:[%s3258_s4 + $0x1f8] sm:$0x1f] %v1924_v49  ;;  %1996 = vst [vmem:[%s3258_s4 + $0x200] sm:$0x1f] %v1925_v25 }
 0x15d   : > { %1997 = vst [vmem:[%s3258_s4 + $0x208] sm:$0x1f] %v1926_v40  ;;  %1998 = vst [vmem:[%s3258_s4 + $0x210] sm:$0x1f] %v1927_v10 }
 0x15e   : > { %1999 = vst [vmem:[%s3258_s4 + $0x218] sm:$0x1f] %v1928_v51  ;;  %2000 = vst [vmem:[%s3258_s4 + $0x220] sm:$0x1f] %v1929_v42 }
 0x15f   : > { %2002 = vst.msk [vmem:[%s3258_s4 + $0x228] sm:$0x1f] %vm2001_vm1, %v1930_v54 }
 0x160 PF: > { %s13_s14 = sadd.s32 1, %s2156_s14   ;;  %s4414_s12 = smov %s2152_s13 }
 0x161   : > { %p10_p5 = scmp.ge.s32.totalorder %s13_s14, 4   ;;  %s4415_s13 = smov %s4417_s15 }
 0x163   :  { %12 = sbr.rel (!%p10_p5) target bundleno = 2 (0x2), region = 62 }

</bundles_post_ra>
